<compile_context>
chip_gen: v5e
topology: v5e:2x2
jax: 0.10.0
libtpu: 0.0.40
codegen_flags: <defaults>
</compile_context>

<pallas_src>
import numpy as np
import jax
import jax.numpy as jnp
from jax.experimental import pallas as pl
from jax.experimental.pallas import tpu as pltpu

LANE = 128     # lane width of the compressed (R, LANE) weight view / N tiling
BK = 128       # K-tile height of each gathered weight tile
ALIGN = 16     # hashed row offsets are multiples of 16 (bf16 sublane packing)


def tile_offsets(layer_idx, K, N, S):
    """Deterministic tiled hash: (n-tile, k-tile) -> row offset into the
    (R, LANE) compressed buffer.  int32 so it can live in SMEM."""
    R = S // LANE
    n_slots = (R - BK) // ALIGN + 1
    tk = np.arange(K // BK)
    tn = np.arange(N // LANE)
    TN, TK = np.meshgrid(tn, tk, indexing="ij")            # (num_tn, num_tk)
    h = (TK * 196613 + TN * 393241 + layer_idx * 769 + 12289) % n_slots
    return (h * ALIGN).astype(np.int32)


def _build_fused_kernel(lens):
    """Kernel: full RzLinear chain applied to one (BM, lens[0]) batch tile."""
    n_layers = len(lens) - 1

    def kernel(off_ref, x_ref, *refs):
        # off_ref : SMEM (total_tiles,) int32  (scalar-prefetched)
        h_refs = refs[:n_layers]                      # (R_i, LANE) bf16, whole-array VMEM
        b_refs = refs[n_layers:2 * n_layers]          # (1, N_i)    f32,  whole-array VMEM
        o_ref = refs[2 * n_layers]                    # (BM, N_last) f32 output block
        w_refs = refs[2 * n_layers + 1:]              # per-layer (K_i, N_i) bf16 scratch

        act = x_ref[...]                              # (BM, lens[0]) bf16
        base = 0
        for li in range(n_layers):
            K, N = lens[li], lens[li + 1]
            num_tk, num_tn = K // BK, N // LANE
            h, ws = h_refs[li], w_refs[li]
            # ROBE-style gather of the virtual (K, N) weight: 16-row-aligned
            # dynamic slices of the compressed buffer copied straight into the
            # resident VMEM scratch (no concatenate chains).
            for tn in range(num_tn):
                for tk in range(num_tk):
                    r = pl.multiple_of(off_ref[base + tn * num_tk + tk], ALIGN)
                    ws[tk * BK:(tk + 1) * BK, tn * LANE:(tn + 1) * LANE] = (
                        h[pl.ds(r, BK), :])
            base += num_tn * num_tk
            # y = x @ W_hash + b : single full-width, K-deep MXU dot, f32 accum.
            y = jnp.dot(act, ws[...], preferred_element_type=jnp.float32)
            y = y + b_refs[li][...]
            if li + 1 < n_layers:
                act = y.astype(jnp.bfloat16)
            else:
                o_ref[...] = y.astype(o_ref.dtype)

    return kernel


def _num_tensorcores():
    """Best-effort TensorCore count of device 0 (v5e/v6e: 1; v4/v5p/v7x: 2)."""
    try:
        kind = jax.devices()[0].device_kind.lower()
    except Exception:
        return 2
    for tag in ("v5e", "v5 lite", "v5lite", "v6e", "v6 lite", "v6lite", "trillium"):
        if tag in kind:
            return 1
    return 2


def _choose_bm(batch, n_cores):
    """Fat batch tiles (amortise per-step overhead + per-step gather) while
    keeping the grid a multiple of the TensorCore count for megacore."""
    if batch <= 16:
        return batch                                   # single full-dim tile
    per_core = -(-batch // n_cores)                    # ceil
    bm = -(-per_core // 16) * 16                       # round up to sublane pack
    return min(512, bm)


class FCNRZPallas:
    """Dense FCNRZ: fused chain of RzLinear layers (reference strips every ReLU)."""

    def __init__(self, arch, sizes, key):
        lens = [int(i) for i in arch.split('-')]
        assert len(sizes) >= len(lens) - 1, "need one compressed size per layer"
        for i in range(len(lens) - 1):
            assert lens[i] % BK == 0, f"in_dim {lens[i]} must be a multiple of {BK}"
            assert lens[i + 1] % LANE == 0, f"out_dim {lens[i+1]} must be a multiple of {LANE}"
            assert sizes[i] % LANE == 0, f"compressed size {sizes[i]} must be a multiple of {LANE}"
            assert sizes[i] // LANE >= BK, "compressed buffer must hold one (BK, LANE) tile"
        self.lens = lens
        self.hashed_weights, self.biases, self.offsets = [], [], []
        flat = []
        for i in range(len(lens) - 1):
            key, k_w, k_b = jax.random.split(key, 3)
            bound = 1.0 / np.sqrt(lens[i])
            # hashed weight ~ U(-1/sqrt(in), 1/sqrt(in)), compressed length sizes[i]
            hw = jax.random.uniform(k_w, (sizes[i],), jnp.float32, -bound, bound)
            b = jax.random.uniform(k_b, (lens[i + 1],), jnp.float32, -bound, bound)
            # compressed buffer stored as a 2-D bf16 (R, LANE) view
            self.hashed_weights.append(
                hw.astype(jnp.bfloat16).reshape(sizes[i] // LANE, LANE))
            self.biases.append(b.reshape(1, lens[i + 1]))
            off = tile_offsets(i, lens[i], lens[i + 1], sizes[i])
            self.offsets.append(off)
            flat.append(off.reshape(-1))
        self.offsets_flat = jnp.asarray(np.concatenate(flat), jnp.int32)

    def __call__(self, x, w=None):
        # dense path of FCNRZ.forward: x = self.model(x); `w` unused.
        B, F0 = x.shape
        lens = self.lens
        assert F0 == lens[0]
        n_layers = len(lens) - 1
        n_out = lens[-1]

        n_cores = _num_tensorcores()
        bm = _choose_bm(B, n_cores)
        grid_m = -(-B // bm)
        b_pad = grid_m * bm

        x_bf16 = jnp.asarray(x).astype(jnp.bfloat16)
        if b_pad != B:
            x_bf16 = jnp.pad(x_bf16, ((0, b_pad - B), (0, 0)))

        kernel = _build_fused_kernel(lens)
        grid_spec = pltpu.PrefetchScalarGridSpec(
            num_scalar_prefetch=1,                     # offset table -> SMEM
            grid=(grid_m,),
            in_specs=(
                [pl.BlockSpec((bm, F0), lambda i, off: (i, 0))]
                # compressed weights + biases: whole-array, resident in VMEM
                + [pl.BlockSpec(memory_space=pltpu.MemorySpace.VMEM)
                   for _ in range(2 * n_layers)]),
            out_specs=pl.BlockSpec((bm, n_out), lambda i, off: (i, 0)),
            scratch_shapes=[pltpu.VMEM((lens[i], lens[i + 1]), jnp.bfloat16)
                            for i in range(n_layers)])

        flops = 2 * b_pad * sum(lens[i] * lens[i + 1] for i in range(n_layers))
        bytes_accessed = int(
            b_pad * F0 * 2
            + sum(int(hw.size) * 2 for hw in self.hashed_weights)
            + sum(int(b.size) * 4 for b in self.biases)
            + b_pad * n_out * 4)
        # rough VMEM budget: resident tables/biases/scratch + 2x-buffered x/out
        vmem_bytes = (sum(int(hw.size) * 2 for hw in self.hashed_weights)
                      + sum(int(b.size) * 4 for b in self.biases)
                      + sum(lens[i] * lens[i + 1] * 2 for i in range(n_layers))
                      + 2 * (bm * F0 * 2 + bm * n_out * 4))
        vmem_limit = int(min(64 * 2 ** 20, max(2 * vmem_bytes, 16 * 2 ** 20)))

        out = pl.pallas_call(
            kernel,
            out_shape=jax.ShapeDtypeStruct((b_pad, n_out), jnp.float32),
            grid_spec=grid_spec,
            compiler_params=pltpu.CompilerParams(
                dimension_semantics=("parallel",),
                vmem_limit_bytes=vmem_limit),
            cost_estimate=pl.CostEstimate(
                flops=flops, transcendentals=0, bytes_accessed=bytes_accessed),
        )(self.offsets_flat, x_bf16, *self.hashed_weights, *self.biases)
        return out[:B] if b_pad != B else out

    # ---- pure-JAX f32 reference ----------------------------------------
    def materialize_weight(self, li):
        K, N = self.lens[li], self.lens[li + 1]
        h = self.hashed_weights[li].astype(jnp.float32)    # (R, LANE)
        off = self.offsets[li]
        W = jnp.zeros((K, N), jnp.float32)
        for tn in range(N // LANE):
            for tk in range(K // BK):
                r = int(off[tn, tk])
                W = W.at[tk * BK:(tk + 1) * BK, tn * LANE:(tn + 1) * LANE].set(
                    h[r:r + BK, :])
        return W

    def reference(self, x):
        act = jnp.asarray(x, jnp.float32)
        for li in range(len(self.lens) - 1):
            act = act @ self.materialize_weight(li) + self.biases[li]
        return act


if __name__ == "__main__":
    arch = "256-256-128"            # lens: 256 -> 256 -> 128  (two RzLinear layers)
    sizes = [32768, 24576]          # compressed hashed-weight lengths per layer
    key = jax.random.PRNGKey(0)
    key, kx = jax.random.split(key)

    model = FCNRZPallas(arch, sizes, key)
    x = jax.random.normal(kx, (256, 256), jnp.float32)     # batch = 256

    y = model(x)
    jax.block_until_ready(y)

    y_ref = model.reference(x)
    # bf16 matmul operands / bf16 input cast vs. f32 reference: bf16-level tol.
    np.testing.assert_allclose(np.asarray(y), np.asarray(y_ref), rtol=2e-2, atol=2e-2)
    print("KERNEL_OK")
</pallas_src>

<mosaic_0001>
module attributes {stable_mosaic.version = 11 : i64} {
  func.func @kernel(%arg0: i32, %arg1: memref<6xi32, #tpu.memory_space<smem>>, %arg2: memref<128x256xbf16, #tpu.memory_space<vmem>>, %arg3: memref<256x128xbf16, #tpu.memory_space<vmem>>, %arg4: memref<192x128xbf16, #tpu.memory_space<vmem>>, %arg5: memref<1x256xf32, #tpu.memory_space<vmem>>, %arg6: memref<1x128xf32, #tpu.memory_space<vmem>>, %arg7: memref<128x128xf32, #tpu.memory_space<vmem>>, %arg8: memref<256x256xbf16, #tpu.memory_space<vmem>>, %arg9: memref<256x128xbf16, #tpu.memory_space<vmem>>) attributes {dimension_semantics = [#tpu.dimension_semantics<parallel>], iteration_bounds = array<i64: 2>, scalar_prefetch = 1 : i64, scratch_operands = 2 : i64, tpu.core_type = #tpu.core_type<tc>, window_params = [{transform_indices = @transform_0, window_bounds = array<i64: 128, 256>}, {pipeline_mode = #tpu.pipeline_mode<synchronous>, transform_indices = @transform_1, window_bounds = array<i64: 256, 128>}, {pipeline_mode = #tpu.pipeline_mode<synchronous>, transform_indices = @transform_2, window_bounds = array<i64: 192, 128>}, {pipeline_mode = #tpu.pipeline_mode<synchronous>, transform_indices = @transform_3, window_bounds = array<i64: 1, 256>}, {pipeline_mode = #tpu.pipeline_mode<synchronous>, transform_indices = @transform_4, window_bounds = array<i64: 1, 128>}, {transform_indices = @transform_5, window_bounds = array<i64: 128, 128>}]} {
    %c0 = arith.constant 0 : index
    %c0_0 = arith.constant 0 : index
    %0 = vector.load %arg2[%c0, %c0_0] : memref<128x256xbf16, #tpu.memory_space<vmem>>, vector<128x256xbf16>
    %c0_1 = arith.constant 0 : index
    %1 = memref.load %arg1[%c0_1] : memref<6xi32, #tpu.memory_space<smem>>
    %2 = tpu.assume_multiple %1, 16 : i32
    %3 = arith.index_cast %2 : i32 to index
    %c0_2 = arith.constant 0 : index
    %4 = vector.load %arg3[%3, %c0_2] : memref<256x128xbf16, #tpu.memory_space<vmem>>, vector<128x128xbf16>
    %c0_3 = arith.constant 0 : index
    %c0_4 = arith.constant 0 : index
    %5 = vector.load %arg8[%c0_3, %c0_4] : memref<256x256xbf16, #tpu.memory_space<vmem>>, vector<128x128xbf16>
    tpu.vector_store %arg8[%c0_3, %c0_4], %4 {strides = array<i32>} : memref<256x256xbf16, #tpu.memory_space<vmem>>, vector<128x128xbf16>,
    %c1 = arith.constant 1 : index
    %6 = memref.load %arg1[%c1] : memref<6xi32, #tpu.memory_space<smem>>
    %7 = tpu.assume_multiple %6, 16 : i32
    %8 = arith.index_cast %7 : i32 to index
    %c0_5 = arith.constant 0 : index
    %9 = vector.load %arg3[%8, %c0_5] : memref<256x128xbf16, #tpu.memory_space<vmem>>, vector<128x128xbf16>
    %c128 = arith.constant 128 : index
    %c0_6 = arith.constant 0 : index
    %10 = vector.load %arg8[%c128, %c0_6] : memref<256x256xbf16, #tpu.memory_space<vmem>>, vector<128x128xbf16>
    tpu.vector_store %arg8[%c128, %c0_6], %9 {strides = array<i32>} : memref<256x256xbf16, #tpu.memory_space<vmem>>, vector<128x128xbf16>,
    %c2 = arith.constant 2 : index
    %11 = memref.load %arg1[%c2] : memref<6xi32, #tpu.memory_space<smem>>
    %12 = tpu.assume_multiple %11, 16 : i32
    %13 = arith.index_cast %12 : i32 to index
    %c0_7 = arith.constant 0 : index
    %14 = vector.load %arg3[%13, %c0_7] : memref<256x128xbf16, #tpu.memory_space<vmem>>, vector<128x128xbf16>
    %c0_8 = arith.constant 0 : index
    %c128_9 = arith.constant 128 : index
    %15 = vector.load %arg8[%c0_8, %c128_9] : memref<256x256xbf16, #tpu.memory_space<vmem>>, vector<128x128xbf16>
    tpu.vector_store %arg8[%c0_8, %c128_9], %14 {strides = array<i32>} : memref<256x256xbf16, #tpu.memory_space<vmem>>, vector<128x128xbf16>,
    %c3 = arith.constant 3 : index
    %16 = memref.load %arg1[%c3] : memref<6xi32, #tpu.memory_space<smem>>
    %17 = tpu.assume_multiple %16, 16 : i32
    %18 = arith.index_cast %17 : i32 to index
    %c0_10 = arith.constant 0 : index
    %19 = vector.load %arg3[%18, %c0_10] : memref<256x128xbf16, #tpu.memory_space<vmem>>, vector<128x128xbf16>
    %c128_11 = arith.constant 128 : index
    %c128_12 = arith.constant 128 : index
    %20 = vector.load %arg8[%c128_11, %c128_12] : memref<256x256xbf16, #tpu.memory_space<vmem>>, vector<128x128xbf16>
    tpu.vector_store %arg8[%c128_11, %c128_12], %19 {strides = array<i32>} : memref<256x256xbf16, #tpu.memory_space<vmem>>, vector<128x128xbf16>,
    %c0_13 = arith.constant 0 : index
    %c0_14 = arith.constant 0 : index
    %21 = vector.load %arg8[%c0_13, %c0_14] : memref<256x256xbf16, #tpu.memory_space<vmem>>, vector<256x256xbf16>
    %cst = arith.constant dense<0.000000e+00> : vector<128x256xf32>
    %22 = tpu.matmul %0, %21, %cst {dimension_numbers = #tpu.dot_dimension_numbers<[1], [0], [0], [1], [0, 0, 1, 1], [], []>} : vector<128x256xbf16>, vector<256x256xbf16>, vector<128x256xf32> -> vector<128x256xf32>
    %c0_15 = arith.constant 0 : index
    %c0_16 = arith.constant 0 : index
    %23 = vector.load %arg5[%c0_15, %c0_16] : memref<1x256xf32, #tpu.memory_space<vmem>>, vector<1x256xf32>
    %24 = vector.broadcast %23 : vector<1x256xf32> to vector<128x256xf32>
    %25 = arith.addf %22, %24 : vector<128x256xf32>
    %26 = arith.truncf %25 : vector<128x256xf32> to vector<128x256xbf16>
    %c4 = arith.constant 4 : index
    %27 = memref.load %arg1[%c4] : memref<6xi32, #tpu.memory_space<smem>>
    %28 = tpu.assume_multiple %27, 16 : i32
    %29 = arith.index_cast %28 : i32 to index
    %c0_17 = arith.constant 0 : index
    %30 = vector.load %arg4[%29, %c0_17] : memref<192x128xbf16, #tpu.memory_space<vmem>>, vector<128x128xbf16>
    %c0_18 = arith.constant 0 : index
    %c0_19 = arith.constant 0 : index
    %31 = vector.load %arg9[%c0_18, %c0_19] : memref<256x128xbf16, #tpu.memory_space<vmem>>, vector<128x128xbf16>
    tpu.vector_store %arg9[%c0_18, %c0_19], %30 {strides = array<i32>} : memref<256x128xbf16, #tpu.memory_space<vmem>>, vector<128x128xbf16>,
    %c5 = arith.constant 5 : index
    %32 = memref.load %arg1[%c5] : memref<6xi32, #tpu.memory_space<smem>>
    %33 = tpu.assume_multiple %32, 16 : i32
    %34 = arith.index_cast %33 : i32 to index
    %c0_20 = arith.constant 0 : index
    %35 = vector.load %arg4[%34, %c0_20] : memref<192x128xbf16, #tpu.memory_space<vmem>>, vector<128x128xbf16>
    %c128_21 = arith.constant 128 : index
    %c0_22 = arith.constant 0 : index
    %36 = vector.load %arg9[%c128_21, %c0_22] : memref<256x128xbf16, #tpu.memory_space<vmem>>, vector<128x128xbf16>
    tpu.vector_store %arg9[%c128_21, %c0_22], %35 {strides = array<i32>} : memref<256x128xbf16, #tpu.memory_space<vmem>>, vector<128x128xbf16>,
    %c0_23 = arith.constant 0 : index
    %c0_24 = arith.constant 0 : index
    %37 = vector.load %arg9[%c0_23, %c0_24] : memref<256x128xbf16, #tpu.memory_space<vmem>>, vector<256x128xbf16>
    %cst_25 = arith.constant dense<0.000000e+00> : vector<128x128xf32>
    %38 = tpu.matmul %26, %37, %cst_25 {dimension_numbers = #tpu.dot_dimension_numbers<[1], [0], [0], [1], [0, 0, 1, 1], [], []>} : vector<128x256xbf16>, vector<256x128xbf16>, vector<128x128xf32> -> vector<128x128xf32>
    %c0_26 = arith.constant 0 : index
    %c0_27 = arith.constant 0 : index
    %39 = vector.load %arg6[%c0_26, %c0_27] : memref<1x128xf32, #tpu.memory_space<vmem>>, vector<1x128xf32>
    %40 = vector.broadcast %39 : vector<1x128xf32> to vector<128x128xf32>
    %41 = arith.addf %38, %40 : vector<128x128xf32>
    %c0_28 = arith.constant 0 : index
    %c0_29 = arith.constant 0 : index
    %42 = vector.load %arg7[%c0_28, %c0_29] : memref<128x128xf32, #tpu.memory_space<vmem>>, vector<128x128xf32>
    tpu.vector_store %arg7[%c0_28, %c0_29], %41 {strides = array<i32>} : memref<128x128xf32, #tpu.memory_space<vmem>>, vector<128x128xf32>,
    return
  }
  func.func @transform_0(%arg0: i32, %arg1: memref<6xi32, #tpu.memory_space<smem>>) -> (i32, i32) {
    %c0_i32 = arith.constant 0 : i32
    %c0_i32_0 = arith.constant 0 : i32
    return %arg0, %c0_i32 : i32, i32
  }
  func.func @transform_1(%arg0: i32, %arg1: memref<6xi32, #tpu.memory_space<smem>>) -> (i32, i32) {
    %c0_i32 = arith.constant 0 : i32
    %c0_i32_0 = arith.constant 0 : i32
    %c0_i32_1 = arith.constant 0 : i32
    return %c0_i32, %c0_i32_0 : i32, i32
  }
  func.func @transform_2(%arg0: i32, %arg1: memref<6xi32, #tpu.memory_space<smem>>) -> (i32, i32) {
    %c0_i32 = arith.constant 0 : i32
    %c0_i32_0 = arith.constant 0 : i32
    %c0_i32_1 = arith.constant 0 : i32
    return %c0_i32, %c0_i32_0 : i32, i32
  }
  func.func @transform_3(%arg0: i32, %arg1: memref<6xi32, #tpu.memory_space<smem>>) -> (i32, i32) {
    %c0_i32 = arith.constant 0 : i32
    %c0_i32_0 = arith.constant 0 : i32
    %c0_i32_1 = arith.constant 0 : i32
    return %c0_i32, %c0_i32_0 : i32, i32
  }
  func.func @transform_4(%arg0: i32, %arg1: memref<6xi32, #tpu.memory_space<smem>>) -> (i32, i32) {
    %c0_i32 = arith.constant 0 : i32
    %c0_i32_0 = arith.constant 0 : i32
    %c0_i32_1 = arith.constant 0 : i32
    return %c0_i32, %c0_i32_0 : i32, i32
  }
  func.func @transform_5(%arg0: i32, %arg1: memref<6xi32, #tpu.memory_space<smem>>) -> (i32, i32) {
    %c0_i32 = arith.constant 0 : i32
    %c0_i32_0 = arith.constant 0 : i32
    return %arg0, %c0_i32 : i32, i32
  }
}

</mosaic_0001>

<bundles_post_ra>
// kernel: tpu_custom_call.1
= control target key start
LH: loop header
LB: loop body
LE: loop exit
PB: predicated region body
PF: predicated region fallthrough
CT: control target
= control target key end

     0   :  { %s2004_s24 = smov [#allocation5]   ;;  %s2480_s0 = inlined_call_operand.hbm [shape: s32[6], index: 0, kind: input, shape index: {}]   ;;  %s2481_s1 = inlined_call_operand.hbm [shape: bf16[256,256], index: 1, kind: input, shape index: {}]   ;;  %s2482_s2 = inlined_call_operand.hbm [shape: bf16[256,128], index: 2, kind: input, shape index: {}]   ;;  %s2483_s3 = inlined_call_operand.hbm [shape: bf16[192,128], index: 3, kind: input, shape index: {}]   ;;  %s2484_s4 = inlined_call_operand.vmem [shape: f32[1,256], index: 4, kind: input, shape index: {}]   ;;  %s2485_s5 = inlined_call_operand.vmem [shape: f32[1,128], index: 5, kind: input, shape index: {}]   ;;  %s2486_s6 = inlined_call_operand.hbm [shape: f32[256,128], index: 6, kind: output, shape index: {}]  }
   0x1   :  { %s12_s23 = sshll.u32 %s2480_s0, 4  ;;  %s13_s23 = int_to_ptr.hbm [resolvable:$true] %s12_s23 }
   0x2   :  { %15 = dma.hbm_to_smem %s13_s23, 16, %s2004_s24, [#allocation4] }
   0x3   :  { %1974 = dma.done.wait [#allocation4], 16 }
   0x4   :  { %1975 = vsyncadd [#allocation4], 4294967280 }
   0x5   :  { %18 = sfence }
   0x6   :  { %19 = vsyncpa [#allocation7], 0 }
   0x7   :  { %21 = vsyncpa [#allocation7 + $0x1], 0 }
   0x8   :  { %22 = vsyncpa [#allocation10], 0 }
   0x9   :  { %23 = vsyncpa [#allocation8], 0 }
   0xa   :  { %25 = vsyncpa [#allocation8 + $0x1], 0  ;;  %s2051_s25 = smov 0   ;;  %s2053_s26 = smov 0  }
   0xb   :  { %s2055_s27 = smov 0   ;;  %s2057_s28 = smov 0  }
   0xc LB: > { %s2072_s0 = sadd.s32 4294967295, %s2002_s28   ;;  %s1384_s29 = sadd.s32 4294967294, %s2002_s28   ;;  %s2002_s28 = sphi %s2057_s28, %s2496_s28   ;;  %s1998_s27 = sphi %s2055_s27, %s2495_s27   ;;  %s1994_s26 = sphi %s2053_s26, %s2494_s26   ;;  %s1990_s25 = sphi %s2051_s25, %s2493_s25  }
   0xd   : > { %p51_p0 = scmp.ne.s32.totalorder %s1994_s26, %s1990_s25  ;;  %p52_p1 = scmp.eq.s32.totalorder %s2072_s0, 0 }
   0xe   : > { %p159_p2 = scmp.eq.s32.totalorder %s2072_s0, 1  ;;  %p165_p3 = scmp.eq.s32.totalorder %s1384_s29, 1 }
   0xf   : > { %p2081_p4 = por %p52_p1, %p51_p0  ;;  %p1385_p5 = scmp.ge.s32.totalorder %s2002_s28, 1 }
  0x10   : > { %p2086_p6 = por %p165_p3, %p51_p0  ;;  %p172_p7 = scmp.lt.s32.totalorder %s2002_s28, 3 }
  0x11   : > { %s183_s10 = sshll.u32 %s2482_s2, 4  ;;  %s2005_s12 = smov [#allocation9]   ;;  %s184_s10 = int_to_ptr.hbm [resolvable:$true] %s183_s10 }
  0x12   : > { %p2094_p8 = pnand %p1385_p5, %p172_p7  ;;  %s185_s13 = sshll.u32 %s2005_s12, 4  ;;  %s186_s13 = int_to_ptr.vmem [resolvable:$true] %s185_s13 }
  0x13   : > { %s197_s16 = sshll.u32 %s2483_s3, 4  ;;  %s2006_s17 = smov 64   ;;  %s198_s16 = int_to_ptr.hbm [resolvable:$true] %s197_s16 }
  0x14   : > { %p1765_p9 = pneg %p2094_p8  ;;  %s2007_s18 = smov 4  }
  0x15   : > { %s2008_s19 = smov [#allocation11]   ;;  %s2107_s21 = sadd.s32 1, %s2002_s28  }
  0x16   : > { %p1766_p10 = pnand %p1765_p9, %p52_p1  ;;  %s199_s20 = sshll.u32 %s2008_s19, 4  ;;  %s200_s20 = int_to_ptr.vmem [resolvable:$true] %s199_s20 }
  0x17   : > { %s38_s22 = sadd.s32 1, %s1998_s27  ;;  %s35_s23 = ssub.s32 %s2002_s28, %s2107_s21 }
  0x18   : > { %1768 = dma.hbm_to_vmem [thread:$0]  (!%p1766_p10), %s184_s10, 2048, %s186_s13, [#allocation10], %s2006_s17, %s2006_s17, %s2007_s18  }
  0x19   : > { %1771 = dma.hbm_to_vmem [thread:$0]  (!%p1766_p10), %s198_s16, 1536, %s200_s20, [#allocation10], %s2006_s17, %s2006_s17, %s2007_s18  }
  0x1a   : > { %p45_p12 = scmp.ne.s32.totalorder %s1998_s27, %s1994_s26  ;;  %p36_p13 = scmp.eq.s32.totalorder %s35_s23, 0 }
  0x1b   : > { %p46_p0 = scmp.eq.s32.totalorder %s2002_s28, 0  ;;  %p1782_p5 = scmp.lt.s32.totalorder %s2002_s28, 2 }
  0x1c   : > { %p2117_p3 = por %p159_p2, %p45_p12  ;;  %s219_s8 = sand.u32 1, %s1998_s27  }
  0x1d   : > { %s2123_s29 = scalar_select %p36_p13, %s1998_s27, %s38_s22  }
  0x1e   : > { %p47_p7 = por %p46_p0, %p45_p12  ;;  %s1389_s9 = sshll.u32 %s219_s8, 7 }
  0x1f   : > { %s1671_s10 = sshll.u32 %s2002_s28, 7  ;;  %s223_s15 = scalar_lea.vmem [#allocation6], %s1389_s9 }
  0x20   : > { %s229_s14 = scalar_lea.hbm %s2481_s1, %s1671_s10  ;;  %s232_s16 = sshll.u32 %s223_s15, 4  ;;  %s233_s16 = int_to_ptr.vmem [resolvable:$true] %s232_s16 }
  0x21   : > { %s230_s17 = sshll.u32 %s229_s14, 4  ;;  %p2130_p2 = pnand %p1782_p5, %p47_p7  ;;  %s231_s17 = int_to_ptr.hbm [resolvable:$true] %s230_s17 }
  0x22   : > { %s220_s19 = scalar_lea.sflag [#allocation7], %s219_s8  ;;  %s1900_s20 = sshra.s32 %s231_s17, 4  ;;  %s1901_s20 = int_to_ptr.hbm [resolvable:$true] %s1900_s20 }
  0x23   : > { %s1902_s22 = scalar_lea.hbm %s1901_s20, 128  ;;  %p1904_p10 = pneg %p2130_p2 }
  0x24   : > { %p1903_p9 = scmp.ne.s32.totalorder %s1901_s20, %s1902_s22  ;;  %s1907_s10 = scalar_lea.hbm %s2481_s1, 256 }
  0x25   : > { %p1908_p0 = scmp.lt.s32.totalorder %s1901_s20, %s2481_s1  ;;  %p1909_p5 = scmp.lt.s32.totalorder %s1907_s10, %s1902_s22 }
  0x26   : > { %p1905_p12 = pnand %p1904_p10, %p1903_p9 }
  0x27   : > { %p1910_p7 = por %p1909_p5, %p1908_p0 }
  0x28   : > { %p1906_p13 = pneg %p1905_p12 }
  0x2a   : > { %p1911_p11 = pnand %p1910_p7, %p1906_p13 }
  0x2c   : > { %1914 = shalt.err (!%p1911_p11)
}
  0x2d   : > { %s2009_s8 = smov 128   ;;  %s2010_s14 = smov 8  }
  0x2e   : > { %1775 = dma.hbm_to_vmem [thread:$0]  (!%p2130_p2), %s231_s17, 2048, %s233_s16, %s220_s19, %s2009_s8, %s2009_s8, %s2010_s14  }
  0x2f   : > { %244 = sbr.rel (%p2094_p8) target bundleno = 569 (0x239), region = 40  ;;  %s2147_s15 = sand.u32 (!%p2094_p8), 1, %s1994_s26  }
  0x30   : > { %s1394_s20 = sshll.u32 (!%p2094_p8), %s2147_s15, 7  ;;  %s247_s22 = scalar_lea.sflag (!%p2094_p8), [#allocation7], %s2147_s15 }
  0x31   : > { %s2153_s23 = scalar_lea.vmem (!%p2094_p8), [#allocation6], %s1394_s20 }
  0x34   : > { %1977 = dma.done.wait (%p2081_p4), %s247_s22, 2048  }
  0x35   : > { %1979 = vsyncadd (%p2081_p4), %s247_s22, 4294965248 }
  0x36   : > { %1981 = dma.done.wait (%p52_p1), [#allocation10], 3584  }
  0x37   : > { %1983 = vsyncadd (%p52_p1), [#allocation10], 4294963712  ;;  %s306_s11 = sld [smem:[#allocation5]] }
  0x38   : > { %s1399_s16 = sld [smem:[#allocation5 + $0x1]] }
  0x39   : > { %s2163_s18 = sld [smem:[#allocation5 + $0x2]] }
  0x3a   : > { %s2178_s13 = sld [smem:[#allocation5 + $0x3]] }
  0x3d   : > { %s307_s17 = sshra.s32 %s306_s11, 3 }
  0x3e   : > { %s1398_s19 = sshll.u32 %s307_s17, 2  ;;  %s344_s9 = sshra.s32 %s1399_s16, 3 }
  0x3f   : > { %s1400_s10 = sshll.u32 %s344_s9, 2  ;;  %s2165_s12 = scalar_lea.vmem [#allocation9], %s1398_s19 }
  0x40   : > { %v325_v0 = vld [vmem:[%s2165_s12 + $0x38] sm:$0xf]  ;;  %v326_v1 = vld [vmem:[%s2165_s12 + $0x3c] sm:$0xf]  ;;  %s2169_s30 = scalar_lea.vmem [#allocation9], %s1400_s10  ;;  %s381_s8 = sshra.s32 %s2163_s18, 3 }
  0x41   : > { %341 = vst [vmem:[#allocation2 + $0x70] sm:$0xf] %v325_v0  ;;  %v362_v2 = vld [vmem:[%s2169_s30 + $0x38] sm:$0xf]  ;;  %v363_v3 = vld [vmem:[%s2169_s30 + $0x3c] sm:$0xf] }
  0x42   : > { %342 = vst [vmem:[#allocation2 + $0x78] sm:$0xf] %v326_v1  ;;  %v323_v4 = vld [vmem:[%s2165_s12 + $0x30] sm:$0xf]  ;;  %v324_v5 = vld [vmem:[%s2165_s12 + $0x34] sm:$0xf] }
  0x43   : > { %378 = vst [vmem:[#allocation2 + $0xf0] sm:$0xf] %v362_v2  ;;  %v360_v6 = vld [vmem:[%s2169_s30 + $0x30] sm:$0xf]  ;;  %v361_v7 = vld [vmem:[%s2169_s30 + $0x34] sm:$0xf] }
  0x44   : > { %379 = vst [vmem:[#allocation2 + $0xf8] sm:$0xf] %v363_v3  ;;  %v321_v8 = vld [vmem:[%s2165_s12 + $0x28] sm:$0xf]  ;;  %v322_v9 = vld [vmem:[%s2165_s12 + $0x2c] sm:$0xf] }
  0x45   : > { %339 = vst [vmem:[#allocation2 + $0x60] sm:$0xf] %v323_v4  ;;  %v358_v11 = vld [vmem:[%s2169_s30 + $0x28] sm:$0xf]  ;;  %v359_v13 = vld [vmem:[%s2169_s30 + $0x2c] sm:$0xf] }
  0x46   : > { %340 = vst [vmem:[#allocation2 + $0x68] sm:$0xf] %v324_v5  ;;  %v319_v16 = vld [vmem:[%s2165_s12 + $0x20] sm:$0xf]  ;;  %v320_v18 = vld [vmem:[%s2165_s12 + $0x24] sm:$0xf] }
  0x47   : > { %376 = vst [vmem:[#allocation2 + $0xe0] sm:$0xf] %v360_v6  ;;  %v356_v21 = vld [vmem:[%s2169_s30 + $0x20] sm:$0xf]  ;;  %v357_v23 = vld [vmem:[%s2169_s30 + $0x24] sm:$0xf] }
  0x48   : > { %v1527_v10 = vld [vmem:[#allocation2 + $0x70] sm:$0xf]  ;;  %377 = vst [vmem:[#allocation2 + $0xe8] sm:$0xf] %v361_v7  ;;  %v318_v28 = vld [vmem:[%s2165_s12 + $0x1c] sm:$0xf] }
  0x49   : > { %v1703_v12 = vld [vmem:[#allocation2 + $0x74] sm:$0xf0]  ;;  %337 = vst [vmem:[#allocation2 + $0x50] sm:$0xf] %v321_v8  ;;  %v317_v26 = vld [vmem:[%s2165_s12 + $0x18] sm:$0xf] }
  0x4a   : > { %v1528_v14 = vor.u32 %v1703_v12, %v1527_v10  ;;  %v1591_v15 = vld [vmem:[#allocation2 + $0xf0] sm:$0xf]  ;;  %338 = vst [vmem:[#allocation2 + $0x58] sm:$0xf] %v322_v9  ;;  %v355_v33 = vld [vmem:[%s2169_s30 + $0x1c] sm:$0xf] }
  0x4b   : > { %v1719_v17 = vld [vmem:[#allocation2 + $0xf4] sm:$0xf0]  ;;  %374 = vst [vmem:[#allocation2 + $0xd0] sm:$0xf] %v358_v11  ;;  %v354_v31 = vld [vmem:[%s2169_s30 + $0x18] sm:$0xf] }
  0x4c   : > { %732 = vmatpush.bf16.msra.mxu0 %v1528_v14  ;;  %1737 = vmatpush.bf16.msra.mxu2 %v1528_v14  ;;  %v1592_v19 = vor.u32 %v1719_v17, %v1591_v15  ;;  %v1519_v20 = vld [vmem:[#allocation2 + $0x60] sm:$0xf]  ;;  %375 = vst [vmem:[#allocation2 + $0xd8] sm:$0xf] %v359_v13  ;;  %v315_v36 = vld [vmem:[%s2165_s12 + $0x10] sm:$0xf] }
  0x4d   : > { %v1701_v22 = vld [vmem:[#allocation2 + $0x64] sm:$0xf0]  ;;  %335 = vst [vmem:[#allocation2 + $0x40] sm:$0xf] %v319_v16  ;;  %v316_v38 = vld [vmem:[%s2165_s12 + $0x14] sm:$0xf] }
  0x4e   : > { %1745 = vmatpush.bf16.msra.mxu3 %v1592_v19  ;;  %781 = vmatpush.bf16.msra.mxu1 %v1592_v19  ;;  %v1520_v24 = vor.u32 %v1701_v22, %v1519_v20  ;;  %v1583_v25 = vld [vmem:[#allocation2 + $0xe0] sm:$0xf]  ;;  %336 = vst [vmem:[#allocation2 + $0x48] sm:$0xf] %v320_v18  ;;  %v352_v41 = vld [vmem:[%s2169_s30 + $0x10] sm:$0xf] }
  0x4f   : > { %v1717_v27 = vld [vmem:[#allocation2 + $0xe4] sm:$0xf0]  ;;  %372 = vst [vmem:[#allocation2 + $0xc0] sm:$0xf] %v356_v21  ;;  %v353_v43 = vld [vmem:[%s2169_s30 + $0x14] sm:$0xf] }
  0x50   : > { %733 = vmatpush.bf16.msra.mxu0 %v1520_v24  ;;  %1738 = vmatpush.bf16.msra.mxu2 %v1520_v24  ;;  %v1584_v29 = vor.u32 %v1717_v27, %v1583_v25  ;;  %v1511_v30 = vld [vmem:[#allocation2 + $0x50] sm:$0xf]  ;;  %373 = vst [vmem:[#allocation2 + $0xc8] sm:$0xf] %v357_v23  ;;  %v313_v46 = vld [vmem:[%s2165_s12 + $0x8] sm:$0xf] }
  0x51   : > { %v1699_v32 = vld [vmem:[#allocation2 + $0x54] sm:$0xf0]  ;;  %333 = vst [vmem:[#allocation2 + $0x30] sm:$0xf] %v317_v26  ;;  %v314_v48 = vld [vmem:[%s2165_s12 + $0xc] sm:$0xf] }
  0x52   : > { %1746 = vmatpush.bf16.msra.mxu3 %v1584_v29  ;;  %782 = vmatpush.bf16.msra.mxu1 %v1584_v29  ;;  %v1512_v34 = vor.u32 %v1699_v32, %v1511_v30  ;;  %v1575_v35 = vld [vmem:[#allocation2 + $0xd0] sm:$0xf]  ;;  %334 = vst [vmem:[#allocation2 + $0x38] sm:$0xf] %v318_v28  ;;  %v350_v51 = vld [vmem:[%s2169_s30 + $0x8] sm:$0xf] }
  0x53   : > { %v1715_v37 = vld [vmem:[#allocation2 + $0xd4] sm:$0xf0]  ;;  %370 = vst [vmem:[#allocation2 + $0xb0] sm:$0xf] %v354_v31  ;;  %v351_v53 = vld [vmem:[%s2169_s30 + $0xc] sm:$0xf] }
  0x54   : > { %734 = vmatpush.bf16.msra.mxu0 %v1512_v34  ;;  %1739 = vmatpush.bf16.msra.mxu2 %v1512_v34  ;;  %v1576_v39 = vor.u32 %v1715_v37, %v1575_v35  ;;  %v1503_v40 = vld [vmem:[#allocation2 + $0x40] sm:$0xf]  ;;  %371 = vst [vmem:[#allocation2 + $0xb8] sm:$0xf] %v355_v33  ;;  %v311_v56 = vld [vmem:[%s2165_s12] sm:$0xf] }
  0x55   : > { %v1697_v42 = vld [vmem:[#allocation2 + $0x44] sm:$0xf0]  ;;  %331 = vst [vmem:[#allocation2 + $0x20] sm:$0xf] %v315_v36  ;;  %v312_v58 = vld [vmem:[%s2165_s12 + $0x4] sm:$0xf] }
  0x56   : > { %1747 = vmatpush.bf16.msra.mxu3 %v1576_v39  ;;  %783 = vmatpush.bf16.msra.mxu1 %v1576_v39  ;;  %v1504_v44 = vor.u32 %v1697_v42, %v1503_v40  ;;  %v1567_v45 = vld [vmem:[#allocation2 + $0xc0] sm:$0xf]  ;;  %332 = vst [vmem:[#allocation2 + $0x28] sm:$0xf] %v316_v38  ;;  %v348_v61 = vld [vmem:[%s2169_s30] sm:$0xf] }
  0x57   : > { %v1713_v47 = vld [vmem:[#allocation2 + $0xc4] sm:$0xf0]  ;;  %368 = vst [vmem:[#allocation2 + $0xa0] sm:$0xf] %v352_v41  ;;  %v349_v63 = vld [vmem:[%s2169_s30 + $0x4] sm:$0xf] }
  0x58   : > { %735 = vmatpush.bf16.msra.mxu0 %v1504_v44  ;;  %1740 = vmatpush.bf16.msra.mxu2 %v1504_v44  ;;  %v1568_v49 = vor.u32 %v1713_v47, %v1567_v45  ;;  %v1495_v50 = vld [vmem:[#allocation2 + $0x30] sm:$0xf]  ;;  %369 = vst [vmem:[#allocation2 + $0xa8] sm:$0xf] %v353_v43  ;;  %s1402_s14 = sshll.u32 %s381_s8, 2  ;;  %s418_s22 = sshra.s32 %s2178_s13, 3 }
  0x59   : > { %v1695_v52 = vld [vmem:[#allocation2 + $0x34] sm:$0xf0]  ;;  %329 = vst [vmem:[#allocation2 + $0x10] sm:$0xf] %v313_v46  ;;  %s1404_s11 = sshll.u32 %s418_s22, 2  ;;  %s2207_s16 = scalar_lea.vmem [#allocation9], %s1402_s14 }
  0x5a   : > { %1748 = vmatpush.bf16.msra.mxu3 %v1568_v49  ;;  %784 = vmatpush.bf16.msra.mxu1 %v1568_v49  ;;  %v1496_v54 = vor.u32 %v1695_v52, %v1495_v50  ;;  %v1559_v55 = vld [vmem:[#allocation2 + $0xb0] sm:$0xf]  ;;  %330 = vst [vmem:[#allocation2 + $0x18] sm:$0xf] %v314_v48  ;;  %v400_v7 = vld [vmem:[%s2207_s16 + $0x3c] sm:$0xf] }
  0x5b   : > { %v1711_v57 = vld [vmem:[#allocation2 + $0xb4] sm:$0xf0]  ;;  %366 = vst [vmem:[#allocation2 + $0x90] sm:$0xf] %v350_v51  ;;  %v399_v5 = vld [vmem:[%s2207_s16 + $0x38] sm:$0xf] }
  0x5c   : > { %736 = vmatpush.bf16.msra.mxu0 %v1496_v54  ;;  %1741 = vmatpush.bf16.msra.mxu2 %v1496_v54  ;;  %v1560_v59 = vor.u32 %v1711_v57, %v1559_v55  ;;  %v1487_v60 = vld [vmem:[#allocation2 + $0x20] sm:$0xf]  ;;  %367 = vst [vmem:[#allocation2 + $0x98] sm:$0xf] %v351_v53  ;;  %v1673_v11 = vld [vmem:[%s2153_s23 + $0x4] sm:$0xf0] }
  0x5d   : > { %v1693_v62 = vld [vmem:[#allocation2 + $0x24] sm:$0xf0]  ;;  %327 = vst [vmem:[#allocation2] sm:$0xf] %v311_v56  ;;  %v1407_v10 = vld [vmem:[%s2153_s23] sm:$0xf] }
  0x5e   : > { %1749 = vmatpush.bf16.msra.mxu3 %v1560_v59  ;;  %785 = vmatpush.bf16.msra.mxu1 %v1560_v59  ;;  %v1488_v0 = vor.u32 %v1693_v62, %v1487_v60  ;;  %v1551_v1 = vld [vmem:[#allocation2 + $0xa0] sm:$0xf]  ;;  %328 = vst [vmem:[#allocation2 + $0x8] sm:$0xf] %v312_v58  ;;  %v1681_v14 = vld [vmem:[%s2153_s23 + $0x44] sm:$0xf0]  ;;  %v2225_v29 = vor.u32 %v1673_v11, %v1407_v10 }
  0x5f   : > { %v1709_v2 = vld [vmem:[#allocation2 + $0xa4] sm:$0xf0]  ;;  %364 = vst [vmem:[#allocation2 + $0x80] sm:$0xf] %v348_v61  ;;  %v1439_v12 = vld [vmem:[%s2153_s23 + $0x40] sm:$0xf] }
  0x60   : > { %737 = vmatpush.bf16.msra.mxu0 %v1488_v0  ;;  %1742 = vmatpush.bf16.msra.mxu2 %v1488_v0  ;;  %v1552_v3 = vor.u32 %v1709_v2, %v1551_v1  ;;  %v1479_v4 = vld [vmem:[#allocation2 + $0x10] sm:$0xf]  ;;  %365 = vst [vmem:[#allocation2 + $0x88] sm:$0xf] %v349_v63  ;;  %v1680_v17 = vld [vmem:[%s2153_s23 + $0x44] sm:$0xf]  ;;  %v2227_v30 = vor.u32 %v1681_v14, %v1439_v12 }
  0x61   : > { %v1691_v6 = vld [vmem:[#allocation2 + $0x14] sm:$0xf0]  ;;  %415 = vst [vmem:[#allocation2 + $0x74] sm:$0xf] %v399_v5  ;;  %v1441_v18 = vld [vmem:[%s2153_s23 + $0x48] sm:$0xf0] }
  0x62   : > { %1750 = vmatpush.bf16.msra.mxu3 %v1552_v3  ;;  %786 = vmatpush.bf16.msra.mxu1 %v1552_v3  ;;  %v1480_v8 = vor.u32 %v1691_v6, %v1479_v4  ;;  %v1543_v9 = vld [vmem:[#allocation2 + $0x90] sm:$0xf]  ;;  %416 = vst [vmem:[#allocation2 + $0x7c] sm:$0xf] %v400_v7  ;;  %v1672_v19 = vld [vmem:[%s2153_s23 + $0x4] sm:$0xf]  ;;  %v2231_v35 = vor.u32 %v1680_v17, %v1441_v18 }
  0x63   : > { %v1707_v13 = vld [vmem:[#allocation2 + $0x94] sm:$0xf0]  ;;  %v1409_v20 = vld [vmem:[%s2153_s23 + $0x8] sm:$0xf0]  ;;  %s2219_s17 = scalar_lea.vmem [#allocation9], %s1404_s11  ;;  %s1597_s18 = sld [smem:[#allocation5 + $0x4]] }
  0x64   : > { %738 = vmatpush.bf16.msra.mxu0 %v1480_v8  ;;  %1743 = vmatpush.bf16.msra.mxu2 %v1480_v8  ;;  %v1544_v15 = vor.u32 %v1707_v13, %v1543_v9  ;;  %v1471_v16 = vld [vmem:[#allocation2] sm:$0xf]  ;;  %v436_v21 = vld [vmem:[%s2219_s17 + $0x38] sm:$0xf]  ;;  %v437_v22 = vld [vmem:[%s2219_s17 + $0x3c] sm:$0xf]  ;;  %v2233_v37 = vor.u32 %v1672_v19, %v1409_v20 }
  0x65   : > { %v1689_v23 = vld [vmem:[#allocation2 + $0x4] sm:$0xf0]  ;;  %452 = vst [vmem:[#allocation2 + $0xf4] sm:$0xf] %v436_v21  ;;  %v398_v27 = vld [vmem:[%s2207_s16 + $0x34] sm:$0xf] }
  0x66   : > { %v397_v24 = vld [vmem:[%s2207_s16 + $0x30] sm:$0xf]  ;;  %1751 = vmatpush.bf16.msra.mxu3 %v1544_v15  ;;  %787 = vmatpush.bf16.msra.mxu1 %v1544_v15  ;;  %v1472_v25 = vor.u32 %v1689_v23, %v1471_v16  ;;  %v1535_v26 = vld [vmem:[#allocation2 + $0x80] sm:$0xf]  ;;  %453 = vst [vmem:[#allocation2 + $0xfc] sm:$0xf] %v437_v22 }
  0x67   : > { %v1705_v28 = vld [vmem:[#allocation2 + $0x84] sm:$0xf0]  ;;  %413 = vst [vmem:[#allocation2 + $0x64] sm:$0xf] %v397_v24  ;;  %v435_v34 = vld [vmem:[%s2219_s17 + $0x34] sm:$0xf] }
  0x68   : > { %v434_v31 = vld [vmem:[%s2219_s17 + $0x30] sm:$0xf]  ;;  %739 = vmatpush.bf16.msra.mxu0 %v1472_v25  ;;  %1744 = vmatpush.bf16.msra.mxu2 %v1472_v25  ;;  %v1536_v32 = vor.u32 %v1705_v28, %v1535_v26  ;;  %v1702_v33 = vld [vmem:[#allocation2 + $0x74] sm:$0xf]  ;;  %414 = vst [vmem:[#allocation2 + $0x6c] sm:$0xf] %v398_v27 }
  0x69   : > { %v1529_v36 = vld [vmem:[#allocation2 + $0x78] sm:$0xf0]  ;;  %450 = vst [vmem:[#allocation2 + $0xe4] sm:$0xf] %v434_v31  ;;  %v395_v40 = vld [vmem:[%s2207_s16 + $0x28] sm:$0xf] }
  0x6a   : > { %1752 = vmatpush.bf16.msra.mxu3 %v1536_v32  ;;  %788 = vmatpush.bf16.msra.mxu1 %v1536_v32  ;;  %v1532_v38 = vor.u32 %v1702_v33, %v1529_v36  ;;  %451 = vst [vmem:[#allocation2 + $0xec] sm:$0xf] %v435_v34  ;;  %v396_v41 = vld [vmem:[%s2207_s16 + $0x2c] sm:$0xf]  ;;  %v432_v46 = vld [vmem:[%s2219_s17 + $0x28] sm:$0xf] }
  0x6b   : > { %740 = vmatmul.bf16.vlgmr.msra.gmra.mxu0 %v2225_v29  ;;  %760 = vmatmul.bf16.vlgmr.msra.gmra.mxu2 %v2227_v30  ;;  %411 = vst [vmem:[#allocation2 + $0x54] sm:$0xf] %v395_v40  ;;  %v433_v47 = vld [vmem:[%s2219_s17 + $0x2c] sm:$0xf]  ;;  %v393_v50 = vld [vmem:[%s2207_s16 + $0x20] sm:$0xf] }
  0x6c   : > { %830 = vmatpush.bf16.msrb.mxu2 %v1532_v38  ;;  %v1718_v39 = vld [vmem:[#allocation2 + $0xf4] sm:$0xf]  ;;  %412 = vst [vmem:[#allocation2 + $0x5c] sm:$0xf] %v396_v41  ;;  %v394_v52 = vld [vmem:[%s2207_s16 + $0x24] sm:$0xf] }
  0x6d   : > { %809 = vmatmul.bf16.vlgmr.msra.gmra.mxu3 %v2231_v35  ;;  %789 = vmatmul.bf16.vlgmr.msra.gmra.mxu1 %v2233_v37  ;;  %v1593_v42 = vld [vmem:[#allocation2 + $0xf8] sm:$0xf0]  ;;  %448 = vst [vmem:[#allocation2 + $0xd4] sm:$0xf] %v432_v46  ;;  %v1415_v54 = vld [vmem:[%s2153_s23 + $0x10] sm:$0xf] }
  0x6e   : > { %v1596_v43 = vor.u32 %v1718_v39, %v1593_v42  ;;  %v1700_v44 = vld [vmem:[#allocation2 + $0x64] sm:$0xf]  ;;  %449 = vst [vmem:[#allocation2 + $0xdc] sm:$0xf] %v433_v47  ;;  %v1675_v55 = vld [vmem:[%s2153_s23 + $0x14] sm:$0xf0] }
  0x6f   : > { %v1521_v45 = vld [vmem:[#allocation2 + $0x68] sm:$0xf0]  ;;  %409 = vst [vmem:[#allocation2 + $0x44] sm:$0xf] %v393_v50  ;;  %v430_v56 = vld [vmem:[%s2219_s17 + $0x20] sm:$0xf]  ;;  %v2256_v4 = vor.u32 %v1675_v55, %v1415_v54 }
  0x70   : > { %879 = vmatpush.bf16.msrb.mxu3 %v1596_v43  ;;  %v1524_v48 = vor.u32 %v1700_v44, %v1521_v45  ;;  %v1716_v49 = vld [vmem:[#allocation2 + $0xe4] sm:$0xf]  ;;  %v431_v57 = vld [vmem:[%s2219_s17 + $0x24] sm:$0xf]  ;;  %v1447_v58 = vld [vmem:[%s2153_s23 + $0x50] sm:$0xf] }
  0x71   : > { %v1585_v51 = vld [vmem:[#allocation2 + $0xe8] sm:$0xf0]  ;;  %v1683_v59 = vld [vmem:[%s2153_s23 + $0x54] sm:$0xf0]  ;;  %410 = vst [vmem:[#allocation2 + $0x4c] sm:$0xf] %v394_v52 }
  0x72   : > { %831 = vmatpush.bf16.msrb.mxu2 %v1524_v48  ;;  %v1588_v53 = vor.u32 %v1716_v49, %v1585_v51  ;;  %v1682_v60 = vld [vmem:[%s2153_s23 + $0x54] sm:$0xf]  ;;  %446 = vst [vmem:[#allocation2 + $0xc4] sm:$0xf] %v430_v56  ;;  %v1449_v62 = vld [vmem:[%s2153_s23 + $0x58] sm:$0xf0]  ;;  %v2258_v5 = vor.u32 %v1683_v59, %v1447_v58 }
  0x73   : > { %v1698_v61 = vld [vmem:[#allocation2 + $0x54] sm:$0xf]  ;;  %v1513_v63 = vld [vmem:[#allocation2 + $0x58] sm:$0xf0]  ;;  %447 = vst [vmem:[#allocation2 + $0xcc] sm:$0xf] %v431_v57  ;;  %v2261_v9 = vor.u32 %v1682_v60, %v1449_v62 }
  0x74   : > { %880 = vmatpush.bf16.msrb.mxu3 %v1588_v53  ;;  %v1516_v0 = vor.u32 %v1698_v61, %v1513_v63  ;;  %v1674_v1 = vld [vmem:[%s2153_s23 + $0x14] sm:$0xf]  ;;  %v1417_v2 = vld [vmem:[%s2153_s23 + $0x18] sm:$0xf0]  ;;  %v391_v3 = vld [vmem:[%s2207_s16 + $0x18] sm:$0xf] }
  0x75   : > { %v1714_v6 = vld [vmem:[#allocation2 + $0xd4] sm:$0xf]  ;;  %407 = vst [vmem:[#allocation2 + $0x34] sm:$0xf] %v391_v3  ;;  %v1577_v8 = vld [vmem:[#allocation2 + $0xd8] sm:$0xf0]  ;;  %v2263_v10 = vor.u32 %v1674_v1, %v1417_v2 }
  0x76   : > { %v392_v7 = vld [vmem:[%s2207_s16 + $0x1c] sm:$0xf]  ;;  %832 = vmatpush.bf16.msrb.mxu2 %v1516_v0  ;;  %v1580_v11 = vor.u32 %v1714_v6, %v1577_v8  ;;  %v1696_v12 = vld [vmem:[#allocation2 + $0x44] sm:$0xf]  ;;  %v428_v13 = vld [vmem:[%s2219_s17 + $0x18] sm:$0xf] }
  0x77   : > { %408 = vst [vmem:[#allocation2 + $0x3c] sm:$0xf] %v392_v7  ;;  %v429_v15 = vld [vmem:[%s2219_s17 + $0x1c] sm:$0xf]  ;;  %v389_v18 = vld [vmem:[%s2207_s16 + $0x10] sm:$0xf] }
  0x78   : > { %v1505_v14 = vld [vmem:[#allocation2 + $0x48] sm:$0xf0]  ;;  %444 = vst [vmem:[#allocation2 + $0xb4] sm:$0xf] %v428_v13  ;;  %881 = vmatpush.bf16.msrb.mxu3 %v1580_v11  ;;  %v426_v22 = vld [vmem:[%s2219_s17 + $0x10] sm:$0xf] }
  0x79   : > { %v1508_v16 = vor.u32 %v1696_v12, %v1505_v14  ;;  %v1712_v17 = vld [vmem:[#allocation2 + $0xc4] sm:$0xf]  ;;  %445 = vst [vmem:[#allocation2 + $0xbc] sm:$0xf] %v429_v15  ;;  %v390_v20 = vld [vmem:[%s2207_s16 + $0x14] sm:$0xf] }
  0x7a   : > { %v1569_v19 = vld [vmem:[#allocation2 + $0xc8] sm:$0xf0]  ;;  %405 = vst [vmem:[#allocation2 + $0x24] sm:$0xf] %v389_v18  ;;  %v387_v28 = vld [vmem:[%s2207_s16 + $0x8] sm:$0xf] }
  0x7b   : > { %745 = vmatmul.bf16.gmra.mxu0 %v2256_v4  ;;  %765 = vmatmul.bf16.gmra.mxu2 %v2258_v5  ;;  %v1572_v21 = vor.u32 %v1712_v17, %v1569_v19  ;;  %406 = vst [vmem:[#allocation2 + $0x2c] sm:$0xf] %v390_v20  ;;  %v427_v23 = vld [vmem:[%s2219_s17 + $0x14] sm:$0xf]  ;;  %v1423_v31 = vld [vmem:[%s2153_s23 + $0x20] sm:$0xf] }
  0x7c   : > { %833 = vmatpush.bf16.msrb.mxu2 %v1508_v16  ;;  %v1694_v24 = vld [vmem:[#allocation2 + $0x34] sm:$0xf]  ;;  %442 = vst [vmem:[#allocation2 + $0xa4] sm:$0xf] %v426_v22  ;;  %v1677_v32 = vld [vmem:[%s2153_s23 + $0x24] sm:$0xf0] }
  0x7d   : > { %814 = vmatmul.bf16.gmra.mxu3 %v2261_v9  ;;  %794 = vmatmul.bf16.gmra.mxu1 %v2263_v10  ;;  %443 = vst [vmem:[#allocation2 + $0xac] sm:$0xf] %v427_v23  ;;  %v1455_v33 = vld [vmem:[%s2153_s23 + $0x60] sm:$0xf]  ;;  %v388_v36 = vld [vmem:[%s2207_s16 + $0xc] sm:$0xf]  ;;  %v2288_v52 = vor.u32 %v1677_v32, %v1423_v31 }
  0x7e   : > { %v1497_v25 = vld [vmem:[#allocation2 + $0x38] sm:$0xf0]  ;;  %882 = vmatpush.bf16.msrb.mxu3 %v1572_v21  ;;  %403 = vst [vmem:[#allocation2 + $0x14] sm:$0xf] %v387_v28  ;;  %v1685_v38 = vld [vmem:[%s2153_s23 + $0x64] sm:$0xf0] }
  0x7f   : > { %v1500_v26 = vor.u32 %v1694_v24, %v1497_v25  ;;  %v1710_v27 = vld [vmem:[#allocation2 + $0xb4] sm:$0xf]  ;;  %404 = vst [vmem:[#allocation2 + $0x1c] sm:$0xf] %v388_v36  ;;  %v1684_v41 = vld [vmem:[%s2153_s23 + $0x64] sm:$0xf]  ;;  %v2290_v53 = vor.u32 %v1685_v38, %v1455_v33 }
  0x80   : > { %v1561_v34 = vld [vmem:[#allocation2 + $0xb8] sm:$0xf0]  ;;  %v1457_v42 = vld [vmem:[%s2153_s23 + $0x68] sm:$0xf0]  ;;  %v1676_v43 = vld [vmem:[%s2153_s23 + $0x24] sm:$0xf] }
  0x81   : > { %834 = vmatpush.bf16.msrb.mxu2 %v1500_v26  ;;  %v1564_v39 = vor.u32 %v1710_v27, %v1561_v34  ;;  %v1692_v40 = vld [vmem:[#allocation2 + $0x24] sm:$0xf]  ;;  %v1425_v44 = vld [vmem:[%s2153_s23 + $0x28] sm:$0xf0]  ;;  %v424_v46 = vld [vmem:[%s2219_s17 + $0x8] sm:$0xf]  ;;  %v2295_v58 = vor.u32 %v1684_v41, %v1457_v42 }
  0x82   : > { %v1489_v45 = vld [vmem:[#allocation2 + $0x28] sm:$0xf0]  ;;  %v425_v49 = vld [vmem:[%s2219_s17 + $0xc] sm:$0xf]  ;;  %440 = vst [vmem:[#allocation2 + $0x94] sm:$0xf] %v424_v46  ;;  %v2297_v59 = vor.u32 %v1676_v43, %v1425_v44 }
  0x83   : > { %883 = vmatpush.bf16.msrb.mxu3 %v1564_v39  ;;  %v1492_v47 = vor.u32 %v1692_v40, %v1489_v45  ;;  %v1708_v48 = vld [vmem:[#allocation2 + $0xa4] sm:$0xf]  ;;  %441 = vst [vmem:[#allocation2 + $0x9c] sm:$0xf] %v425_v49  ;;  %v385_v51 = vld [vmem:[%s2207_s16] sm:$0xf] }
  0x84   : > { %v1553_v50 = vld [vmem:[#allocation2 + $0xa8] sm:$0xf0]  ;;  %v386_v55 = vld [vmem:[%s2207_s16 + $0x4] sm:$0xf]  ;;  %401 = vst [vmem:[#allocation2 + $0x4] sm:$0xf] %v385_v51 }
  0x85   : > { %835 = vmatpush.bf16.msrb.mxu2 %v1492_v47  ;;  %v1556_v54 = vor.u32 %v1708_v48, %v1553_v50  ;;  %v422_v56 = vld [vmem:[%s2219_s17] sm:$0xf]  ;;  %402 = vst [vmem:[#allocation2 + $0xc] sm:$0xf] %v386_v55  ;;  %v423_v57 = vld [vmem:[%s2219_s17 + $0x4] sm:$0xf] }
  0x86   : > { %v1690_v60 = vld [vmem:[#allocation2 + $0x14] sm:$0xf]  ;;  %438 = vst [vmem:[#allocation2 + $0x84] sm:$0xf] %v422_v56  ;;  %v1481_v61 = vld [vmem:[#allocation2 + $0x18] sm:$0xf0] }
  0x87   : > { %884 = vmatpush.bf16.msrb.mxu3 %v1556_v54  ;;  %439 = vst [vmem:[#allocation2 + $0x8c] sm:$0xf] %v423_v57  ;;  %v1484_v62 = vor.u32 %v1690_v60, %v1481_v61  ;;  %v1431_v12 = vld [vmem:[%s2153_s23 + $0x30] sm:$0xf]  ;;  %v1679_v13 = vld [vmem:[%s2153_s23 + $0x34] sm:$0xf0] }
  0x88   : > { %v1463_v14 = vld [vmem:[%s2153_s23 + $0x70] sm:$0xf]  ;;  %v1687_v15 = vld [vmem:[%s2153_s23 + $0x74] sm:$0xf0]  ;;  %v1686_v16 = vld [vmem:[%s2153_s23 + $0x74] sm:$0xf]  ;;  %v1432_v20 = vor.u32 %v1679_v13, %v1431_v12 }
  0x89   : > { %v1706_v63 = vld [vmem:[#allocation2 + $0x94] sm:$0xf]  ;;  %836 = vmatpush.bf16.msrb.mxu2 %v1484_v62  ;;  %v1465_v17 = vld [vmem:[%s2153_s23 + $0x78] sm:$0xf0]  ;;  %v2311_v21 = vor.u32 %v1687_v15, %v1463_v14  ;;  %s945_s19 = sshra.s32 %s1597_s18, 3  ;;  %s1599_s10 = sld [smem:[#allocation5 + $0x5]] }
  0x8a   : > { %v1545_v0 = vld [vmem:[#allocation2 + $0x98] sm:$0xf0]  ;;  %v1678_v18 = vld [vmem:[%s2153_s23 + $0x34] sm:$0xf]  ;;  %v2313_v22 = vor.u32 %v1686_v16, %v1465_v17  ;;  %s1598_s9 = sshll.u32 %s945_s19, 2  ;;  %s2413_s16 = scalar_lea.vmem [#allocation12], %s1394_s20 }
  0x8b   : > { %750 = vmatmul.bf16.gmra.mxu0 %v2288_v52  ;;  %770 = vmatmul.bf16.gmra.mxu2 %v2290_v53  ;;  %v1548_v1 = vor.u32 %v1706_v63, %v1545_v0  ;;  %v1688_v2 = vld [vmem:[#allocation2 + $0x4] sm:$0xf]  ;;  %v1433_v19 = vld [vmem:[%s2153_s23 + $0x38] sm:$0xf0]  ;;  %s948_s23 = scalar_lea.vmem [#allocation11], %s1598_s9  ;;  %s1736_s20 = sshll.u32 %s2072_s0, 7 }
  0x8c   : > { %v1473_v3 = vld [vmem:[#allocation2 + $0x8] sm:$0xf0]  ;;  %v1436_v23 = vor.u32 %v1678_v18, %v1433_v19  ;;  %v963_v24 = vld [vmem:[%s948_s23 + $0x38] sm:$0xff]   ;;  %v959_v27 = vld [vmem:[%s948_s23 + $0x28] sm:$0xff]   ;;  %s1276_s19 = scalar_lea.hbm %s2486_s6, %s1736_s20  ;;  %s1277_s9 = sshll.u32 %s2413_s16, 4  ;;  %s1278_s9 = int_to_ptr.vmem [resolvable:$true] %s1277_s9 }
  0x8d   : > { %819 = vmatmul.bf16.gmra.mxu3 %v2295_v58  ;;  %799 = vmatmul.bf16.gmra.mxu1 %v2297_v59  ;;  %v1476_v6 = vor.u32 %v1688_v2, %v1473_v3  ;;  %v1704_v7 = vld [vmem:[#allocation2 + $0x84] sm:$0xf]  ;;  %979 = vst [vmem:[#allocation3 + $0x38] sm:$0xff] %v963_v24   ;;  %v961_v25 = vld [vmem:[%s948_s23 + $0x30] sm:$0xff]   ;;  %v957_v31 = vld [vmem:[%s948_s23 + $0x20] sm:$0xff]   ;;  %s1950_s8 = scalar_lea.hbm %s2486_s6, 256 }
  0x8e   : > { %885 = vmatpush.bf16.msrb.mxu3 %v1548_v1  ;;  %v1537_v8 = vld [vmem:[#allocation2 + $0x88] sm:$0xf0]  ;;  %977 = vst [vmem:[#allocation3 + $0x30] sm:$0xff] %v961_v25   ;;  %v955_v32 = vld [vmem:[%s948_s23 + $0x18] sm:$0xff]   ;;  %v951_v36 = vld [vmem:[%s948_s23 + $0x8] sm:$0xff]  }
  0x8f   : > { %837 = vmatpush.bf16.msrb.mxu2 %v1476_v6  ;;  %v1540_v11 = vor.u32 %v1704_v7, %v1537_v8  ;;  %975 = vst [vmem:[#allocation3 + $0x28] sm:$0xff] %v959_v27   ;;  %v953_v33 = vld [vmem:[%s948_s23 + $0x10] sm:$0xff]   ;;  %v949_v38 = vld [vmem:[%s948_s23] sm:$0xff]   ;;  %s982_s12 = sshra.s32 %s1599_s10, 3  ;;  %s1279_s23 = sshll.u32 %s1276_s19, 4  ;;  %s1280_s23 = int_to_ptr.hbm [resolvable:$true] %s1279_s23 }
  0x90   : > { %973 = vst [vmem:[#allocation3 + $0x20] sm:$0xff] %v957_v31   ;;  %s1600_s30 = sshll.u32 %s982_s12, 2  ;;  %v2330_v43 = vld [vmem:[%s2484_s4] sm:$0x3]  ;;  %s1265_s10 = scalar_lea.sflag [#allocation8], %s2147_s15 }
  0x91   : > { %971 = vst [vmem:[#allocation3 + $0x18] sm:$0xff] %v955_v32   ;;  %s2323_s13 = scalar_lea.vmem [#allocation11], %s1600_s30  ;;  %v2333_v46 = vperm.slane %v2330_v43, 0  ;;  %s1944_s0 = sshra.s32 %s1280_s23, 4  ;;  %s1945_s0 = int_to_ptr.hbm [resolvable:$true] %s1944_s0 }
  0x92   : > { %886 = vmatpush.bf16.msrb.mxu3 %v1540_v11  ;;  %969 = vst [vmem:[#allocation3 + $0x10] sm:$0xff] %v953_v33   ;;  %v1000_v40 = vld [vmem:[%s2323_s13 + $0x38] sm:$0xff]   ;;  %v998_v41 = vld [vmem:[%s2323_s13 + $0x30] sm:$0xff]   ;;  %v996_v49 = vld [vmem:[%s2323_s13 + $0x28] sm:$0xff]   ;;  %s1946_s12 = scalar_lea.hbm %s1945_s0, 128  ;;  %p1951_p11 = scmp.lt.s32.totalorder %s1945_s0, %s2486_s6 }
  0x93   : > { %967 = vst [vmem:[#allocation3 + $0x8] sm:$0xff] %v951_v36   ;;  %v994_v60 = vld [vmem:[%s2323_s13 + $0x20] sm:$0xff]   ;;  %v992_v11 = vld [vmem:[%s2323_s13 + $0x18] sm:$0xff]   ;;  %v988_v31 = vld [vmem:[%s2323_s13 + $0x8] sm:$0xff]   ;;  %p1947_p1 = scmp.ne.s32.totalorder %s1945_s0, %s1946_s12  ;;  %p1952_p2 = scmp.lt.s32.totalorder %s1950_s8, %s1946_s12 }
  0x94   : > { %v1727_v26 = vld [vmem:[#allocation3 + $0x38] sm:$0xff]  ;;  %965 = vst [vmem:[#allocation3] sm:$0xff] %v949_v38  }
  0x95   : > { %1150 = vmatpush.bf16.msrb.mxu0 %v1727_v26  ;;  %v1726_v28 = vld [vmem:[#allocation3 + $0x30] sm:$0xff]  ;;  %1016 = vst [vmem:[#allocation3 + $0x78] sm:$0xff] %v1000_v40   ;;  %p1948_p4 = pnand %p1947_p1, %p2117_p3  ;;  %p1953_p9 = por %p1952_p2, %p1951_p11 }
  0x96   : > { %1014 = vst [vmem:[#allocation3 + $0x70] sm:$0xff] %v998_v41   ;;  %v986_v41 = vld [vmem:[%s2323_s13] sm:$0xff]  }
  0x97   : > { %1012 = vst [vmem:[#allocation3 + $0x68] sm:$0xff] %v996_v49   ;;  %p1949_p8 = pneg %p1948_p4 }
  0x98   : > { %v1723_v34 = vld [vmem:[#allocation3 + $0x18] sm:$0xff]  ;;  %1010 = vst [vmem:[#allocation3 + $0x60] sm:$0xff] %v994_v60  }
  0x99   : > { %1151 = vmatpush.bf16.msrb.mxu0 %v1726_v28  ;;  %1008 = vst [vmem:[#allocation3 + $0x58] sm:$0xff] %v992_v11   ;;  %p1954_p10 = pnand %p1953_p9, %p1949_p8 }
  0x9a   : > { %1004 = vst [vmem:[#allocation3 + $0x48] sm:$0xff] %v988_v31  }
  0x9b   : > { %755 = vmatmul.bf16.gmra.mxu0 %v1432_v20  ;;  %775 = vmatmul.bf16.gmra.mxu2 %v2311_v21  ;;  %v1720_v39 = vld [vmem:[#allocation3] sm:$0xff]  ;;  %1002 = vst [vmem:[#allocation3 + $0x40] sm:$0xff] %v986_v41  }
  0x9c   : > { %v1735_v42 = vld [vmem:[#allocation3 + $0x78] sm:$0xff] }
  0x9d   : > { %824 = vmatmul.bf16.gmra.mxu3 %v2313_v22  ;;  %804 = vmatmul.bf16.gmra.mxu1 %v1436_v23  ;;  %v1734_v47 = vld [vmem:[#allocation3 + $0x70] sm:$0xff] }
  0x9e   : > { %1199 = vmatpush.bf16.msrb.mxu1 %v1735_v42 }
  0x9f   : > { %v1732_v6 = vld [vmem:[#allocation3 + $0x60] sm:$0xff] }
  0xa2   : > { %1200 = vmatpush.bf16.msrb.mxu1 %v1734_v47 }
  0xab   : > { %838 = vmatmul.bf16.vlgmr.msrb.gmra.mxu2 %v2225_v29  ;;  %v1725_v29 = vld [vmem:[#allocation3 + $0x28] sm:$0xff] }
  0xac   : > { %1152 = vmatpush.bf16.msrb.mxu0 %v1725_v29 }
  0xad   : > { %887 = vmatmul.bf16.vlgmr.msrb.gmra.mxu3 %v2233_v37  ;;  %v1724_v37 = vld [vmem:[#allocation3 + $0x20] sm:$0xff] }
  0xb0   : > { %1153 = vmatpush.bf16.msrb.mxu0 %v1724_v37 }
  0xb4   : > { %1154 = vmatpush.bf16.msrb.mxu0 %v1723_v34 }
  0xbb   : > { %843 = vmatmul.bf16.gmra.mxu2 %v2256_v4  ;;  %v1722_v4 = vld [vmem:[#allocation3 + $0x10] sm:$0xff] }
  0xbc   : > { %1155 = vmatpush.bf16.msrb.mxu0 %v1722_v4 }
  0xbd   : > { %892 = vmatmul.bf16.gmra.mxu3 %v2263_v10  ;;  %v1721_v10 = vld [vmem:[#allocation3 + $0x8] sm:$0xff] }
  0xc0   : > { %1156 = vmatpush.bf16.msrb.mxu0 %v1721_v10 }
  0xc4   : > { %1157 = vmatpush.bf16.msrb.mxu0 %v1720_v39 }
  0xcb   : > { %848 = vmatmul.bf16.gmra.mxu2 %v2288_v52 }
  0xcd   : > { %897 = vmatmul.bf16.gmra.mxu3 %v2297_v59 }
  0xdb   : > { %853 = vmatmul.bf16.gmra.mxu2 %v1432_v20  ;;  %v990_v20 = vld [vmem:[%s2323_s13 + $0x10] sm:$0xff]  }
  0xdc   : > { %1006 = vst [vmem:[#allocation3 + $0x50] sm:$0xff] %v990_v20  }
  0xdd   : > { %902 = vmatmul.bf16.gmra.mxu3 %v1436_v23 }
  0xe3   : > { %v1730_v32 = vld [vmem:[#allocation3 + $0x50] sm:$0xff] }
  0xe8   : > { %v741_v44 = vpop.f32.mrf.mxu0 }
  0xe9   : > { %v742_v48 = vadd.f32 %v741_v44, %v2333_v46 }
  0xea   : > { %v790_v45 = vpop.f32.mrf.mxu1 }
  0xeb   : > { %858 = vmatmul.bf16.gmra.mxu2 %v2227_v30  ;;  %v791_v55 = vadd.f32 %v790_v45, %v742_v48 }
  0xed   : > { %907 = vmatmul.bf16.gmra.mxu3 %v2231_v35  ;;  %v1733_v35 = vld [vmem:[#allocation3 + $0x68] sm:$0xff] }
  0xee   : > { %v761_v50 = vpop.f32.mrf.mxu2  ;;  %1201 = vmatpush.bf16.msrb.mxu1 %v1733_v35 }
  0xef   : > { %v762_v51 = vadd.f32 %v761_v50, %v2333_v46 }
  0xf0   : > { %v810_v52 = vpop.f32.mrf.mxu3  ;;  %v743_v54 = vpop.f32.mrf.mxu0 }
  0xf1   : > { %v2340_v56 = vadd.f32 %v810_v52, %v762_v51  ;;  %v744_v57 = vadd.f32 %v743_v54, %v2333_v46  ;;  %v1728_v51 = vld [vmem:[#allocation3 + $0x40] sm:$0xff] }
  0xf2   : > { %v792_v30 = vpop.f32.mrf.mxu1  ;;  %1202 = vmatpush.bf16.msrb.mxu1 %v1732_v6 }
  0xf3   : > { %v793_v59 = vadd.f32 %v792_v30, %v744_v57 }
  0xf5   : > { %v928_v61 = vpack.c.bf16 %v793_v59, %v791_v55 }
  0xf6   : > { %v763_v62 = vpop.f32.mrf.mxu2 }
  0xf7   : > { %v764_v63 = vadd.f32 %v763_v62, %v2333_v46  ;;  %1158 = vmatmul.bf16.vlgmr.msrb.gmra.mxu0 %v928_v61 }
  0xf8   : > { %v812_v0 = vpop.f32.mrf.mxu3  ;;  %v746_v1 = vpop.f32.mrf.mxu0 }
  0xf9   : > { %v2345_v2 = vadd.f32 %v812_v0, %v764_v63  ;;  %v747_v8 = vadd.f32 %v746_v1, %v2333_v46 }
  0xfa   : > { %v795_v3 = vpop.f32.mrf.mxu1 }
  0xfb   : > { %863 = vmatmul.bf16.gmra.mxu2 %v2258_v5  ;;  %v936_v7 = vpack.c.bf16 %v2345_v2, %v2340_v56  ;;  %v796_v16 = vadd.f32 %v795_v3, %v747_v8 }
  0xfd   : > { %912 = vmatmul.bf16.gmra.mxu3 %v2261_v9  ;;  %v1731_v9 = vld [vmem:[#allocation3 + $0x58] sm:$0xff] }
  0xfe   : > { %v766_v12 = vpop.f32.mrf.mxu2  ;;  %1203 = vmatpush.bf16.msrb.mxu1 %v1731_v9 }
  0xff   : > { %v767_v13 = vadd.f32 %v766_v12, %v2333_v46 }
 0x100   : > { %v815_v14 = vpop.f32.mrf.mxu3  ;;  %v748_v15 = vpop.f32.mrf.mxu0 }
 0x101   : > { %v2354_v5 = vadd.f32 %v815_v14, %v767_v13  ;;  %v749_v17 = vadd.f32 %v748_v15, %v2333_v46  ;;  %v2381_v13 = vperm.slane %v2330_v43, 1 }
 0x102   : > { %v797_v18 = vpop.f32.mrf.mxu1  ;;  %1204 = vmatpush.bf16.msrb.mxu1 %v1730_v32 }
 0x103   : > { %v798_v19 = vadd.f32 %v797_v18, %v749_v17 }
 0x105   : > { %v930_v23 = vpack.c.bf16 %v798_v19, %v796_v16 }
 0x106   : > { %v768_v24 = vpop.f32.mrf.mxu2 }
 0x107   : > { %v769_v25 = vadd.f32 %v768_v24, %v2333_v46  ;;  %1163 = vmatmul.bf16.gmra.mxu0 %v930_v23 }
 0x108   : > { %v817_v26 = vpop.f32.mrf.mxu3  ;;  %v751_v27 = vpop.f32.mrf.mxu0 }
 0x109   : > { %v2359_v28 = vadd.f32 %v817_v26, %v769_v25  ;;  %v752_v33 = vadd.f32 %v751_v27, %v2333_v46 }
 0x10a   : > { %v800_v29 = vpop.f32.mrf.mxu1 }
 0x10b   : > { %868 = vmatmul.bf16.gmra.mxu2 %v2290_v53  ;;  %v938_v37 = vpack.c.bf16 %v2359_v28, %v2354_v5  ;;  %v801_v10 = vadd.f32 %v800_v29, %v752_v33  ;;  %v1729_v53 = vld [vmem:[#allocation3 + $0x48] sm:$0xff] }
 0x10c   : > { %1205 = vmatpush.bf16.msrb.mxu1 %v1729_v53 }
 0x10d   : > { %917 = vmatmul.bf16.gmra.mxu3 %v2295_v58 }
 0x10e   : > { %v771_v34 = vpop.f32.mrf.mxu2 }
 0x10f   : > { %v772_v36 = vadd.f32 %v771_v34, %v2333_v46 }
 0x110   : > { %v820_v4 = vpop.f32.mrf.mxu3  ;;  %v753_v38 = vpop.f32.mrf.mxu0  ;;  %1206 = vmatpush.bf16.msrb.mxu1 %v1728_v51 }
 0x111   : > { %v2368_v39 = vadd.f32 %v820_v4, %v772_v36  ;;  %v754_v40 = vadd.f32 %v753_v38, %v2333_v46 }
 0x112   : > { %v802_v42 = vpop.f32.mrf.mxu1 }
 0x113   : > { %v803_v44 = vadd.f32 %v802_v42, %v754_v40 }
 0x115   : > { %v932_v45 = vpack.c.bf16 %v803_v44, %v801_v10 }
 0x116   : > { %v773_v47 = vpop.f32.mrf.mxu2 }
 0x117   : > { %v774_v58 = vadd.f32 %v773_v47, %v2333_v46  ;;  %1168 = vmatmul.bf16.gmra.mxu0 %v932_v45 }
 0x118   : > { %v822_v48 = vpop.f32.mrf.mxu3  ;;  %v756_v49 = vpop.f32.mrf.mxu0 }
 0x119   : > { %v823_v50 = vadd.f32 %v822_v48, %v774_v58  ;;  %v757_v55 = vadd.f32 %v756_v49, %v2333_v46 }
 0x11a   : > { %v805_v52 = vpop.f32.mrf.mxu1 }
 0x11b   : > { %873 = vmatmul.bf16.gmra.mxu2 %v2311_v21  ;;  %v940_v54 = vpack.c.bf16 %v823_v50, %v2368_v39  ;;  %v806_v61 = vadd.f32 %v805_v52, %v757_v55 }
 0x11d   : > { %922 = vmatmul.bf16.gmra.mxu3 %v2313_v22 }
 0x11e   : > { %v776_v57 = vpop.f32.mrf.mxu2 }
 0x11f   : > { %v777_v30 = vadd.f32 %v776_v57, %v2333_v46 }
 0x120   : > { %v825_v59 = vpop.f32.mrf.mxu3  ;;  %v758_v60 = vpop.f32.mrf.mxu0 }
 0x121   : > { %v826_v35 = vadd.f32 %v825_v59, %v777_v30  ;;  %v759_v62 = vadd.f32 %v758_v60, %v2333_v46 }
 0x122   : > { %v807_v63 = vpop.f32.mrf.mxu1 }
 0x123   : > { %v808_v0 = vadd.f32 %v807_v63, %v759_v62 }
 0x125   : > { %v934_v1 = vpack.c.bf16 %v808_v0, %v806_v61 }
 0x126   : > { %v778_v21 = vpop.f32.mrf.mxu2 }
 0x127   : > { %v779_v3 = vadd.f32 %v778_v21, %v2333_v46  ;;  %1173 = vmatmul.bf16.gmra.mxu0 %v934_v1 }
 0x128   : > { %v827_v6 = vpop.f32.mrf.mxu3 }
 0x129   : > { %v828_v8 = vadd.f32 %v827_v6, %v779_v3 }
 0x12b   : > { %v942_v11 = vpack.c.bf16 %v828_v8, %v826_v35 }
 0x12e   : > { %v839_v22 = vpop.f32.mrf.mxu2 }
 0x12f   : > { %v840_v14 = vadd.f32 %v839_v22, %v2381_v13 }
 0x130   : > { %v888_v12 = vpop.f32.mrf.mxu3 }
 0x131   : > { %v889_v46 = vadd.f32 %v888_v12, %v840_v14 }
 0x136   : > { %v841_v15 = vpop.f32.mrf.mxu2 }
 0x137   : > { %v842_v16 = vadd.f32 %v841_v15, %v2381_v13  ;;  %1178 = vmatmul.bf16.gmra.mxu0 %v936_v7 }
 0x138   : > { %v890_v17 = vpop.f32.mrf.mxu3 }
 0x139   : > { %v891_v18 = vadd.f32 %v890_v17, %v842_v16 }
 0x13b   : > { %v929_v19 = vpack.c.bf16 %v891_v18, %v889_v46 }
 0x13d   : > { %1207 = vmatmul.bf16.vlgmr.msrb.gmra.mxu1 %v929_v19 }
 0x13e   : > { %v844_v20 = vpop.f32.mrf.mxu2 }
 0x13f   : > { %v845_v9 = vadd.f32 %v844_v20, %v2381_v13 }
 0x140   : > { %v893_v23 = vpop.f32.mrf.mxu3 }
 0x141   : > { %v894_v26 = vadd.f32 %v893_v23, %v845_v9 }
 0x146   : > { %v846_v43 = vpop.f32.mrf.mxu2 }
 0x147   : > { %v847_v24 = vadd.f32 %v846_v43, %v2381_v13  ;;  %1183 = vmatmul.bf16.gmra.mxu0 %v938_v37  ;;  %v2408_v43 = vld [vmem:[%s2485_s5] ss:$0 sm:$0xff] }
 0x148   : > { %v895_v25 = vpop.f32.mrf.mxu3 }
 0x149   : > { %v896_v56 = vadd.f32 %v895_v25, %v847_v24 }
 0x14b   : > { %v931_v2 = vpack.c.bf16 %v896_v56, %v894_v26 }
 0x14d   : > { %1212 = vmatmul.bf16.gmra.mxu1 %v931_v2 }
 0x14e   : > { %v849_v7 = vpop.f32.mrf.mxu2 }
 0x14f   : > { %v850_v31 = vadd.f32 %v849_v7, %v2381_v13 }
 0x150   : > { %v898_v27 = vpop.f32.mrf.mxu3 }
 0x151   : > { %v899_v34 = vadd.f32 %v898_v27, %v850_v31 }
 0x156   : > { %v851_v29 = vpop.f32.mrf.mxu2 }
 0x157   : > { %v852_v32 = vadd.f32 %v851_v29, %v2381_v13  ;;  %1188 = vmatmul.bf16.gmra.mxu0 %v940_v54 }
 0x158   : > { %v900_v33 = vpop.f32.mrf.mxu3 }
 0x159   : > { %v901_v36 = vadd.f32 %v900_v33, %v852_v32 }
 0x15b   : > { %v933_v4 = vpack.c.bf16 %v901_v36, %v899_v34 }
 0x15d   : > { %1217 = vmatmul.bf16.gmra.mxu1 %v933_v4 }
 0x15e   : > { %v854_v5 = vpop.f32.mrf.mxu2 }
 0x15f   : > { %v855_v37 = vadd.f32 %v854_v5, %v2381_v13 }
 0x160   : > { %v903_v28 = vpop.f32.mrf.mxu3 }
 0x161   : > { %v904_v40 = vadd.f32 %v903_v28, %v855_v37 }
 0x166   : > { %v856_v38 = vpop.f32.mrf.mxu2 }
 0x167   : > { %v857_v10 = vadd.f32 %v856_v38, %v2381_v13  ;;  %1193 = vmatmul.bf16.gmra.mxu0 %v942_v11 }
 0x168   : > { %v905_v39 = vpop.f32.mrf.mxu3 }
 0x169   : > { %v906_v53 = vadd.f32 %v905_v39, %v857_v10 }
 0x16b   : > { %v935_v41 = vpack.c.bf16 %v906_v53, %v904_v40 }
 0x16d   : > { %1222 = vmatmul.bf16.gmra.mxu1 %v935_v41 }
 0x16e   : > { %v859_v42 = vpop.f32.mrf.mxu2 }
 0x16f   : > { %v860_v45 = vadd.f32 %v859_v42, %v2381_v13 }
 0x170   : > { %v908_v44 = vpop.f32.mrf.mxu3 }
 0x171   : > { %v909_v49 = vadd.f32 %v908_v44, %v860_v45 }
 0x174   : > { %v1159_v3 = vpop.f32.mrf.mxu0 }
 0x175   : > { %v1160_v25 = vadd.f32 %v2408_v43, %v1159_v3 }
 0x176   : > { %v861_v47 = vpop.f32.mrf.mxu2 }
 0x177   : > { %v862_v58 = vadd.f32 %v861_v47, %v2381_v13 }
 0x178   : > { %v910_v48 = vpop.f32.mrf.mxu3 }
 0x179   : > { %v911_v50 = vadd.f32 %v910_v48, %v862_v58 }
 0x17b   : > { %v937_v51 = vpack.c.bf16 %v911_v50, %v909_v49 }
 0x17c   : > { %v1161_v15 = vpop.f32.mrf.mxu0 }
 0x17d   : > { %1227 = vmatmul.bf16.gmra.mxu1 %v937_v51  ;;  %v1162_v2 = vadd.f32 %v2408_v43, %v1161_v15 }
 0x17e   : > { %v864_v52 = vpop.f32.mrf.mxu2 }
 0x17f   : > { %v865_v55 = vadd.f32 %v864_v52, %v2381_v13 }
 0x180   : > { %v913_v54 = vpop.f32.mrf.mxu3 }
 0x181   : > { %v914_v60 = vadd.f32 %v913_v54, %v865_v55 }
 0x184   : > { %v1164_v9 = vpop.f32.mrf.mxu0 }
 0x185   : > { %v1165_v31 = vadd.f32 %v2408_v43, %v1164_v9 }
 0x186   : > { %v866_v57 = vpop.f32.mrf.mxu2 }
 0x187   : > { %v867_v30 = vadd.f32 %v866_v57, %v2381_v13 }
 0x188   : > { %v915_v59 = vpop.f32.mrf.mxu3 }
 0x189   : > { %v916_v61 = vadd.f32 %v915_v59, %v867_v30 }
 0x18b   : > { %v939_v35 = vpack.c.bf16 %v916_v61, %v914_v60 }
 0x18c   : > { %v1166_v24 = vpop.f32.mrf.mxu0 }
 0x18d   : > { %1232 = vmatmul.bf16.gmra.mxu1 %v939_v35  ;;  %v1167_v34 = vadd.f32 %v2408_v43, %v1166_v24 }
 0x18e   : > { %v869_v62 = vpop.f32.mrf.mxu2 }
 0x18f   : > { %v870_v0 = vadd.f32 %v869_v62, %v2381_v13 }
 0x190   : > { %v918_v63 = vpop.f32.mrf.mxu3 }
 0x191   : > { %v919_v8 = vadd.f32 %v918_v63, %v870_v0 }
 0x196   : > { %v871_v1 = vpop.f32.mrf.mxu2 }
 0x197   : > { %v872_v21 = vadd.f32 %v871_v1, %v2381_v13 }
 0x198   : > { %v920_v6 = vpop.f32.mrf.mxu3 }
 0x199   : > { %v921_v11 = vadd.f32 %v920_v6, %v872_v21 }
 0x19b   : > { %v941_v22 = vpack.c.bf16 %v921_v11, %v919_v8 }
 0x19d   : > { %1237 = vmatmul.bf16.gmra.mxu1 %v941_v22 }
 0x19e   : > { %v874_v12 = vpop.f32.mrf.mxu2 }
 0x19f   : > { %v875_v16 = vadd.f32 %v874_v12, %v2381_v13 }
 0x1a0   : > { %v923_v14 = vpop.f32.mrf.mxu3 }
 0x1a1   : > { %v924_v19 = vadd.f32 %v923_v14, %v875_v16 }
 0x1a6   : > { %v876_v17 = vpop.f32.mrf.mxu2 }
 0x1a7   : > { %v877_v46 = vadd.f32 %v876_v17, %v2381_v13  ;;  %v1169_v13 = vpop.f32.mrf.mxu0 }
 0x1a8   : > { %v925_v18 = vpop.f32.mrf.mxu3  ;;  %v1170_v28 = vadd.f32 %v2408_v43, %v1169_v13 }
 0x1a9   : > { %v926_v20 = vadd.f32 %v925_v18, %v877_v46 }
 0x1ab   : > { %v943_v23 = vpack.c.bf16 %v926_v20, %v924_v19 }
 0x1ad   : > { %1242 = vmatmul.bf16.gmra.mxu1 %v943_v23 }
 0x1af   : > { %v1171_v29 = vpop.f32.mrf.mxu0 }
 0x1b0   : > { %v1172_v39 = vadd.f32 %v2408_v43, %v1171_v29 }
 0x1b7   : > { %v1174_v5 = vpop.f32.mrf.mxu0 }
 0x1b8   : > { %v1175_v42 = vadd.f32 %v2408_v43, %v1174_v5 }
 0x1ba   : > { %v1208_v26 = vpop.f32.mrf.mxu1 }
 0x1bb   : > { %v1209_v56 = vadd.f32 %v1208_v26, %v1160_v25 }
 0x1bd   : > { %1248 = vst [vmem:[%s2413_s16] sm:$0xff] %v1209_v56 }
 0x1bf   : > { %v1176_v10 = vpop.f32.mrf.mxu0 }
 0x1c0   : > { %v1177_v47 = vadd.f32 %v2408_v43, %v1176_v10 }
 0x1c2   : > { %v1210_v7 = vpop.f32.mrf.mxu1 }
 0x1c3   : > { %v1211_v27 = vadd.f32 %v1210_v7, %v1162_v2 }
 0x1c5   : > { %1249 = vst [vmem:[%s2413_s16 + $0x8] sm:$0xff] %v1211_v27 }
 0x1c7   : > { %v1179_v41 = vpop.f32.mrf.mxu0 }
 0x1c8   : > { %v1180_v50 = vadd.f32 %v2408_v43, %v1179_v41 }
 0x1ca   : > { %v1213_v32 = vpop.f32.mrf.mxu1 }
 0x1cb   : > { %v1214_v33 = vadd.f32 %v1213_v32, %v1165_v31 }
 0x1cd   : > { %1250 = vst [vmem:[%s2413_s16 + $0x10] sm:$0xff] %v1214_v33 }
 0x1cf   : > { %v1181_v58 = vpop.f32.mrf.mxu0 }
 0x1d0   : > { %v1182_v55 = vadd.f32 %v2408_v43, %v1181_v58 }
 0x1d2   : > { %v1215_v36 = vpop.f32.mrf.mxu1 }
 0x1d3   : > { %v1216_v4 = vadd.f32 %v1215_v36, %v1167_v34 }
 0x1d5   : > { %1251 = vst [vmem:[%s2413_s16 + $0x18] sm:$0xff] %v1216_v4 }
 0x1d7   : > { %v1184_v54 = vpop.f32.mrf.mxu0 }
 0x1d8   : > { %v1185_v60 = vadd.f32 %v2408_v43, %v1184_v54 }
 0x1da   : > { %v1218_v37 = vpop.f32.mrf.mxu1 }
 0x1db   : > { %v1219_v38 = vadd.f32 %v1218_v37, %v1170_v28 }
 0x1dd   : > { %1252 = vst [vmem:[%s2413_s16 + $0x20] sm:$0xff] %v1219_v38 }
 0x1df   : > { %v1186_v59 = vpop.f32.mrf.mxu0 }
 0x1e0   : > { %v1187_v63 = vadd.f32 %v2408_v43, %v1186_v59 }
 0x1e2   : > { %v1220_v40 = vpop.f32.mrf.mxu1 }
 0x1e3   : > { %v1221_v53 = vadd.f32 %v1220_v40, %v1172_v39 }
 0x1e5   : > { %1253 = vst [vmem:[%s2413_s16 + $0x28] sm:$0xff] %v1221_v53 }
 0x1e7   : > { %v1189_v62 = vpop.f32.mrf.mxu0 }
 0x1e8   : > { %v1190_v21 = vadd.f32 %v2408_v43, %v1189_v62 }
 0x1ea   : > { %v1223_v44 = vpop.f32.mrf.mxu1 }
 0x1eb   : > { %v1224_v45 = vadd.f32 %v1223_v44, %v1175_v42 }
 0x1ed   : > { %1254 = vst [vmem:[%s2413_s16 + $0x30] sm:$0xff] %v1224_v45 }
 0x1ef   : > { %v1191_v3 = vpop.f32.mrf.mxu0 }
 0x1f0   : > { %v1192_v11 = vadd.f32 %v2408_v43, %v1191_v3 }
 0x1f2   : > { %v1225_v48 = vpop.f32.mrf.mxu1 }
 0x1f3   : > { %v1226_v49 = vadd.f32 %v1225_v48, %v1177_v47 }
 0x1f5   : > { %1255 = vst [vmem:[%s2413_s16 + $0x38] sm:$0xff] %v1226_v49 }
 0x1f7   : > { %v1194_v14 = vpop.f32.mrf.mxu0 }
 0x1f8   : > { %v1195_v15 = vadd.f32 %v2408_v43, %v1194_v14 }
 0x1fa   : > { %v1228_v51 = vpop.f32.mrf.mxu1 }
 0x1fb   : > { %v1229_v52 = vadd.f32 %v1228_v51, %v1180_v50 }
 0x1fd   : > { %1256 = vst [vmem:[%s2413_s16 + $0x40] sm:$0xff] %v1229_v52 }
 0x1ff   : > { %v1196_v46 = vpop.f32.mrf.mxu0 }
 0x200   : > { %v1197_v18 = vadd.f32 %v2408_v43, %v1196_v46 }
 0x202   : > { %v1230_v57 = vpop.f32.mrf.mxu1 }
 0x203   : > { %v1231_v30 = vadd.f32 %v1230_v57, %v1182_v55 }
 0x205   : > { %1257 = vst [vmem:[%s2413_s16 + $0x48] sm:$0xff] %v1231_v30 }
 0x20a   : > { %v1233_v61 = vpop.f32.mrf.mxu1 }
 0x20b   : > { %v1234_v35 = vadd.f32 %v1233_v61, %v1185_v60 }
 0x20d   : > { %1258 = vst [vmem:[%s2413_s16 + $0x50] sm:$0xff] %v1234_v35 }
 0x212   : > { %v1235_v0 = vpop.f32.mrf.mxu1 }
 0x213   : > { %v1236_v1 = vadd.f32 %v1235_v0, %v1187_v63 }
 0x215   : > { %1259 = vst [vmem:[%s2413_s16 + $0x58] sm:$0xff] %v1236_v1 }
 0x21a   : > { %v1238_v6 = vpop.f32.mrf.mxu1 }
 0x21b   : > { %v1239_v8 = vadd.f32 %v1238_v6, %v1190_v21 }
 0x21d   : > { %1260 = vst [vmem:[%s2413_s16 + $0x60] sm:$0xff] %v1239_v8 }
 0x222   : > { %v1240_v22 = vpop.f32.mrf.mxu1 }
 0x223   : > { %v1241_v12 = vadd.f32 %v1240_v22, %v1192_v11 }
 0x225   : > { %1261 = vst [vmem:[%s2413_s16 + $0x68] sm:$0xff] %v1241_v12 }
 0x22a   : > { %v1243_v16 = vpop.f32.mrf.mxu1 }
 0x22b   : > { %v1244_v17 = vadd.f32 %v1243_v16, %v1195_v15 }
 0x22d   : > { %1262 = vst [vmem:[%s2413_s16 + $0x70] sm:$0xff] %v1244_v17 }
 0x232   : > { %v1245_v19 = vpop.f32.mrf.mxu1 }
 0x233   : > { %v1246_v20 = vadd.f32 %v1245_v19, %v1197_v18 }
 0x235   : > { %1263 = vst [vmem:[%s2413_s16 + $0x78] sm:$0xff] %v1246_v20 }
 0x236   : > { %1957 = shalt.err (!%p1954_p10)
}
 0x237   : > { %s2011_s15 = smov 128   ;;  %s2012_s11 = smov 8  }
 0x238   : > { %1763 = dma.vmem_to_hbm [thread:$0]  (%p2117_p3), %s1278_s9, 2048, %s1280_s23, %s1265_s10, %s2011_s15, %s2011_s15, %s2012_s11  }
 0x239 PF: > { %s1294_s16 = sand.u32 1, %s1990_s25   ;;  %p2492_p12 = scmp.ge.s32.totalorder %s2002_s28, 2 }
 0x23a   : > { %s1295_s20 = scalar_lea.sflag [#allocation8], %s1294_s16 }
 0x23b   : > { %p1777_p13 = pnand %p2492_p12, %p2086_p6 }
 0x23d   : > { %p1778_p0 = pneg %p1777_p13 }
 0x23f   : > { %1985 = dma.done.wait (%p1778_p0), %s1295_s20, 2048  }
 0x240   : > { %1987 = vsyncadd (%p1778_p0), %s1295_s20, 4294965248  ;;  %p28_p5 = scmp.ge.s32.totalorder %s2107_s21, 4   ;;  %s2493_s25 = smov %s1994_s26 }
 0x241   : > { %s2494_s26 = smov %s1998_s27  ;;  %s2495_s27 = smov %s2123_s29 }
 0x242   : > { %s2496_s28 = smov %s2107_s21  ;;  %30 = sbr.rel (!%p28_p5) target bundleno = 12 (0xc), region = 99 }
 0x247   :  { %1301 = vsyncpa [#allocation7], 1 }
 0x248   :  { %1303 = vsyncpa [#allocation7 + $0x1], 1 }
 0x249   :  { %1304 = vsyncpa [#allocation10], 1 }
 0x24a   :  { %1305 = vsyncpa [#allocation8], 1 }
 0x24b   :  { %1307 = vsyncpa [#allocation8 + $0x1], 1 }

</bundles_post_ra>
